<compile_context>
chip_gen: v6e
topology: v6e:2x2x1
jax: 0.10.0
libtpu: 0.0.40
codegen_flags: <defaults>
</compile_context>

<pallas_src>
import functools

import jax
import jax.numpy as jnp
from jax import lax
from jax.experimental import pallas as pl
from jax.experimental.pallas import tpu as pltpu

LANES = 128            # TPU lane width; all feature dims are padded to this.
HIDDEN = (16, 12, 6)   # hidden widths of the original nn.Sequential


def acc_policy_kernel(x_ref, w_ref, o_ref):
    """x_ref: (TILE_B, 128) activations, lane 127 == 1.0 (bias carrier).
    w_ref: (4, 128, 128) packed augmented weights (bias folded into row 127,
           W[k, 127, 127] == 1.0 keeps the ones-lane alive across layers).
    o_ref: (TILE_B, 128) lane-dense output slab (first output_d lanes real).
    """
    h = x_ref[...]
    # Layers 1-3: fused matmul (+bias via ones-lane) and ReLU.
    # ReLU(1) == 1 preserves the ones-lane; padded lanes stay exactly 0.
    for k in range(3):
        h = jnp.maximum(
            jnp.dot(h, w_ref[k],
                    preferred_element_type=jnp.float32,
                    precision=lax.Precision.HIGHEST),
            0.0)
    # Final linear layer (no activation).
    o_ref[...] = jnp.dot(h, w_ref[3],
                         preferred_element_type=jnp.float32,
                         precision=lax.Precision.HIGHEST).astype(o_ref.dtype)


def _round_up(n, m):
    return (n + m - 1) // m * m


@functools.partial(jax.jit, static_argnames=("output_d", "tile_b"))
def acc_policy_forward(x, w_packed, *, output_d, tile_b=1024):
    """x: (B, input_d) float32. w_packed: (4, 128, 128) from pack_params()."""
    B, input_d = x.shape

    # Batch tile: as large as requested, clamped to the (sublane-aligned) batch.
    tb = min(tile_b, _round_up(max(B, 8), 8))
    tb = _round_up(tb, 8)
    Bp = _round_up(B, tb)

    # Lane-dense, zero-padded activation slab with the bias "ones lane".
    x_pad = jnp.zeros((Bp, LANES), jnp.float32)
    x_pad = x_pad.at[:B, :input_d].set(x.astype(jnp.float32))
    x_pad = x_pad.at[:, LANES - 1].set(1.0)

    out_pad = pl.pallas_call(
        acc_policy_kernel,
        out_shape=jax.ShapeDtypeStruct((Bp, LANES), jnp.float32),
        grid=(Bp // tb,),
        in_specs=[
            pl.BlockSpec((tb, LANES), lambda i: (i, 0)),            # activations
            pl.BlockSpec((4, LANES, LANES), lambda i: (0, 0, 0)),   # params (VMEM-resident)
        ],
        out_specs=pl.BlockSpec((tb, LANES), lambda i: (i, 0)),
        compiler_params=pltpu.CompilerParams(
            dimension_semantics=("parallel",)),   # shard batch over v7x's 2 TCs
    )(x_pad, w_packed)

    return out_pad[:B, :output_d]


def init_params(input_d, output_d, key):
    """Synthetic init matching nn.Linear shapes; W stored as (in, out) == W_pt.T."""
    dims = [(input_d, HIDDEN[0]), (HIDDEN[0], HIDDEN[1]),
            (HIDDEN[1], HIDDEN[2]), (HIDDEN[2], output_d)]
    params = {}
    for idx, (d_in, d_out) in enumerate(dims, start=1):
        key, kw, kb = jax.random.split(key, 3)
        bound = 1.0 / jnp.sqrt(d_in)  # same scale family as nn.Linear default
        params[f"w{idx}"] = jax.random.uniform(
            kw, (d_in, d_out), jnp.float32, -bound, bound)
        params[f"b{idx}"] = jax.random.uniform(
            kb, (d_out,), jnp.float32, -bound, bound)
    return params


def pack_params(params):
    """Pack the 4 (W, b) pairs into one (4, 128, 128) augmented-weight buffer.

    W_aug[k, :d_in, :d_out] = W_k
    W_aug[k, 127, :d_out]   = b_k        (bias row, hit by the ones-lane)
    W_aug[k, 127, 127]      = 1.0        (propagates the ones-lane forward)
    All other entries are zero, so padded lanes stay zero through the network.
    """
    w_packed = jnp.zeros((4, LANES, LANES), jnp.float32)
    for k in range(4):
        w = params[f"w{k + 1}"]
        b = params[f"b{k + 1}"]
        d_in, d_out = w.shape
        w_packed = w_packed.at[k, :d_in, :d_out].set(w)
        w_packed = w_packed.at[k, LANES - 1, :d_out].set(b)
        w_packed = w_packed.at[k, LANES - 1, LANES - 1].set(1.0)
    return w_packed


def reference_forward(x, params):
    h = x
    for idx in range(1, 5):
        h = jnp.dot(h, params[f"w{idx}"],
                    precision=lax.Precision.HIGHEST) + params[f"b{idx}"]
        if idx < 4:
            h = jnp.maximum(h, 0.0)
    return h


if __name__ == "__main__":
    key = jax.random.PRNGKey(0)
    input_d, output_d, batch = 8, 4, 8

    key, kx = jax.random.split(key)
    x = jax.random.normal(kx, (batch, input_d), jnp.float32)
    params = init_params(input_d, output_d, key)
    w_packed = pack_params(params)

    out = acc_policy_forward(x, w_packed, output_d=output_d)
    out = jax.block_until_ready(out)
    ref = reference_forward(x, params)
    assert out.shape == (batch, output_d)
    assert jnp.allclose(out, ref, atol=1e-5, rtol=1e-5), "mismatch (small batch)"

    # Exercise the tiled / padded multi-step grid path (grid = 3 steps here).
    key, kx2 = jax.random.split(key)
    x_big = jax.random.normal(kx2, (300, input_d), jnp.float32)
    out_big = jax.block_until_ready(
        acc_policy_forward(x_big, w_packed, output_d=output_d, tile_b=128))
    ref_big = reference_forward(x_big, params)
    assert out_big.shape == (300, output_d)
    assert jnp.allclose(out_big, ref_big, atol=1e-5, rtol=1e-5), "mismatch (tiled batch)"

    print("KERNEL_OK")
</pallas_src>

<mosaic_0001>
module attributes {stable_mosaic.version = 11 : i64} {
  func.func @acc_policy_kernel(%arg0: i32, %arg1: memref<8x128xf32, #tpu.memory_space<vmem>>, %arg2: memref<4x128x128xf32, #tpu.memory_space<vmem>>, %arg3: memref<8x128xf32, #tpu.memory_space<vmem>>) attributes {dimension_semantics = [#tpu.dimension_semantics<parallel>], iteration_bounds = array<i64: 1>, scalar_prefetch = 0 : i64, scratch_operands = 0 : i64, tpu.core_type = #tpu.core_type<tc>, window_params = [{transform_indices = @transform_0, window_bounds = array<i64: 8, 128>}, {pipeline_mode = #tpu.pipeline_mode<synchronous>, transform_indices = @transform_1, window_bounds = array<i64: 4, 128, 128>}, {transform_indices = @transform_2, window_bounds = array<i64: 8, 128>}]} {
    %c0 = arith.constant 0 : index
    %c0_0 = arith.constant 0 : index
    %0 = vector.load %arg1[%c0, %c0_0] : memref<8x128xf32, #tpu.memory_space<vmem>>, vector<8x128xf32>
    %c0_1 = arith.constant 0 : index
    %c0_2 = arith.constant 0 : index
    %c0_3 = arith.constant 0 : index
    %1 = vector.load %arg2[%c0_1, %c0_2, %c0_3] : memref<4x128x128xf32, #tpu.memory_space<vmem>>, vector<1x128x128xf32>
    %2 = vector.shape_cast %1 : vector<1x128x128xf32> to vector<128x128xf32>
    %cst = arith.constant dense<0.000000e+00> : vector<8x128xf32>
    %3 = tpu.matmul %0, %2, %cst {dimension_numbers = #tpu.dot_dimension_numbers<[1], [0], [0], [1], [0, 0, 1, 1], [], []>, precision = #tpu.contract_precision<fp32>} : vector<8x128xf32>, vector<128x128xf32>, vector<8x128xf32> -> vector<8x128xf32>
    %cst_4 = arith.constant 0.000000e+00 : f32
    %4 = vector.broadcast %cst_4 : f32 to vector<8x128xf32>
    %5 = arith.maximumf %3, %4 : vector<8x128xf32>
    %c1 = arith.constant 1 : index
    %c0_5 = arith.constant 0 : index
    %c0_6 = arith.constant 0 : index
    %6 = vector.load %arg2[%c1, %c0_5, %c0_6] : memref<4x128x128xf32, #tpu.memory_space<vmem>>, vector<1x128x128xf32>
    %7 = vector.shape_cast %6 : vector<1x128x128xf32> to vector<128x128xf32>
    %cst_7 = arith.constant dense<0.000000e+00> : vector<8x128xf32>
    %8 = tpu.matmul %5, %7, %cst_7 {dimension_numbers = #tpu.dot_dimension_numbers<[1], [0], [0], [1], [0, 0, 1, 1], [], []>, precision = #tpu.contract_precision<fp32>} : vector<8x128xf32>, vector<128x128xf32>, vector<8x128xf32> -> vector<8x128xf32>
    %cst_8 = arith.constant 0.000000e+00 : f32
    %9 = vector.broadcast %cst_8 : f32 to vector<8x128xf32>
    %10 = arith.maximumf %8, %9 : vector<8x128xf32>
    %c2 = arith.constant 2 : index
    %c0_9 = arith.constant 0 : index
    %c0_10 = arith.constant 0 : index
    %11 = vector.load %arg2[%c2, %c0_9, %c0_10] : memref<4x128x128xf32, #tpu.memory_space<vmem>>, vector<1x128x128xf32>
    %12 = vector.shape_cast %11 : vector<1x128x128xf32> to vector<128x128xf32>
    %cst_11 = arith.constant dense<0.000000e+00> : vector<8x128xf32>
    %13 = tpu.matmul %10, %12, %cst_11 {dimension_numbers = #tpu.dot_dimension_numbers<[1], [0], [0], [1], [0, 0, 1, 1], [], []>, precision = #tpu.contract_precision<fp32>} : vector<8x128xf32>, vector<128x128xf32>, vector<8x128xf32> -> vector<8x128xf32>
    %cst_12 = arith.constant 0.000000e+00 : f32
    %14 = vector.broadcast %cst_12 : f32 to vector<8x128xf32>
    %15 = arith.maximumf %13, %14 : vector<8x128xf32>
    %c3 = arith.constant 3 : index
    %c0_13 = arith.constant 0 : index
    %c0_14 = arith.constant 0 : index
    %16 = vector.load %arg2[%c3, %c0_13, %c0_14] : memref<4x128x128xf32, #tpu.memory_space<vmem>>, vector<1x128x128xf32>
    %17 = vector.shape_cast %16 : vector<1x128x128xf32> to vector<128x128xf32>
    %cst_15 = arith.constant dense<0.000000e+00> : vector<8x128xf32>
    %18 = tpu.matmul %15, %17, %cst_15 {dimension_numbers = #tpu.dot_dimension_numbers<[1], [0], [0], [1], [0, 0, 1, 1], [], []>, precision = #tpu.contract_precision<fp32>} : vector<8x128xf32>, vector<128x128xf32>, vector<8x128xf32> -> vector<8x128xf32>
    %c0_16 = arith.constant 0 : index
    %c0_17 = arith.constant 0 : index
    %19 = vector.load %arg3[%c0_16, %c0_17] : memref<8x128xf32, #tpu.memory_space<vmem>>, vector<8x128xf32>
    tpu.vector_store %arg3[%c0_16, %c0_17], %18 {strides = array<i32>} : memref<8x128xf32, #tpu.memory_space<vmem>>, vector<8x128xf32>,
    return
  }
  func.func @transform_0(%arg0: i32) -> (i32, i32) {
    %c0_i32 = arith.constant 0 : i32
    %c0_i32_0 = arith.constant 0 : i32
    return %arg0, %c0_i32 : i32, i32
  }
  func.func @transform_1(%arg0: i32) -> (i32, i32, i32) {
    %c0_i32 = arith.constant 0 : i32
    %c0_i32_0 = arith.constant 0 : i32
    %c0_i32_1 = arith.constant 0 : i32
    %c0_i32_2 = arith.constant 0 : i32
    return %c0_i32, %c0_i32_0, %c0_i32_1 : i32, i32, i32
  }
  func.func @transform_2(%arg0: i32) -> (i32, i32) {
    %c0_i32 = arith.constant 0 : i32
    %c0_i32_0 = arith.constant 0 : i32
    return %arg0, %c0_i32 : i32, i32
  }
}

</mosaic_0001>

<bundles_post_ra>
// kernel: acc_policy_forward.1
= control target key start
LH: loop header
LB: loop body
LE: loop exit
PB: predicated region body
PF: predicated region fallthrough
CT: control target
= control target key end

     0   :  { %7 = vsyncpa [#allocation3], 0  ;;  %s3941_s9 = smov [#allocation2]   ;;  %s5410_s0 = inlined_call_operand.vmem [shape: f32[8,128], index: 0, kind: input, shape index: {}]   ;;  %s5411_s1 = inlined_call_operand.hbm [shape: f32[4,128,128], index: 1, kind: input, shape index: {}]   ;;  %s5412_s2 = inlined_call_operand.vmem [shape: f32[8,128], index: 2, kind: output, shape index: {}]  }
   0x1   :  { %s15_s10 = sshll.u32 %s3941_s9, 4  ;;  %s16_s10 = int_to_ptr.vmem [resolvable:$true] %s15_s10 }
   0x2   :  { %s3927_s11 = scalar_lea.vmem %s16_s10, 8192  ;;  %p3932_p1 = scmp.lt.s32.totalorder %s16_s10, %s16_s10 }
   0x3   :  { %p3928_p0 = scmp.ne.s32.totalorder %s16_s10, %s3927_s11  ;;  %p3933_p2 = scmp.lt.s32.totalorder %s3927_s11, %s3927_s11 }
   0x5   :  { %p3934_p3 = por %p3933_p2, %p3932_p1 }
   0x7   :  { %p3935_p4 = pnand %p3934_p3, %p3928_p0 }
   0x9   :  { %3938 = shalt.err (!%p3935_p4)
}
   0xa   :  { %s3942_s12 = smov 128   ;;  %s3943_s13 = smov 8  }
   0xb   :  { %21 = dma.hbm_to_vmem [thread:$0]  %s5411_s1, 8192, %s16_s10, [#allocation3], %s3942_s12, %s3942_s12, %s3943_s13  }
   0xc   :  { %3939 = dma.done.wait [#allocation3], 8192  }
   0xd   :  { %3940 = vsyncadd [#allocation3], 4294959104  ;;  %v3944_v0 = vmov 0.0   ;;  %vm3945_vm0 = vmmov 0   ;;  %v41_v1 = vld [vmem:[#allocation2 + $0x78] sm:$0xff]  ;;  %v40_v2 = vld [vmem:[#allocation2 + $0x70] sm:$0xff] }
   0xe   :  { %3074 = vmatprep.subr.mxu0 %v3944_v0  ;;  %3109 = vmatprep.subr.mxu1 %v3944_v0  ;;  %v39_v3 = vld [vmem:[#allocation2 + $0x68] sm:$0xff]  ;;  %v3970_v4 = vand.u32 4294901760, %v41_v1  ;;  %v3972_v5 = vand.u32 4294901760, %v40_v2  ;;  %v38_v7 = vld [vmem:[#allocation2 + $0x60] sm:$0xff]  ;;  %v37_v8 = vld [vmem:[#allocation2 + $0x58] sm:$0xff] }
   0xf   :  { %3106 = vmatprep.mubr.msk.f32.mxu0 %vm3945_vm0, %v3944_v0  ;;  %3141 = vmatprep.mubr.msk.f32.mxu1 %vm3945_vm0, %v3944_v0  ;;  %v3974_v6 = vand.u32 4294901760, %v39_v3  ;;  %v36_v9 = vld [vmem:[#allocation2 + $0x50] sm:$0xff]  ;;  %v3976_v10 = vand.u32 4294901760, %v38_v7  ;;  %v3978_v11 = vand.u32 4294901760, %v37_v8  ;;  %v35_v13 = vld [vmem:[#allocation2 + $0x48] sm:$0xff]  ;;  %v34_v14 = vld [vmem:[#allocation2 + $0x40] sm:$0xff] }
  0x10   :  { %v3980_v12 = vand.u32 4294901760, %v36_v9  ;;  %3075 = vmatpush3.msra.mxu0 %v3970_v4  ;;  %v3984_v15 = vsub.f32 %v41_v1, %v3970_v4  ;;  %v3987_v16 = vsub.f32 %v40_v2, %v3972_v5  ;;  %v3989_v17 = vand.u32 4294901760, %v35_v13  ;;  %v33_v19 = vld [vmem:[#allocation2 + $0x38] sm:$0xff]  ;;  %v32_v26 = vld [vmem:[#allocation2 + $0x30] sm:$0xff]  ;;  %v31_v36 = vld [vmem:[#allocation2 + $0x28] sm:$0xff] }
  0x11   :  { %v3992_v18 = vsub.f32 %v39_v3, %v3974_v6  ;;  %3076 = vmatprep.subr.mxu0 %v3944_v0  ;;  %v3996_v20 = vsub.f32 %v38_v7, %v3976_v10  ;;  %v3999_v21 = vsub.f32 %v37_v8, %v3978_v11  ;;  %v4005_v25 = vand.u32 4294901760, %v34_v14  ;;  %v30_v41 = vld [vmem:[#allocation2 + $0x20] sm:$0xff]  ;;  %v29_v49 = vld [vmem:[#allocation2 + $0x18] sm:$0xff]  ;;  %v28_v54 = vld [vmem:[#allocation2 + $0x10] sm:$0xff] }
  0x12   :  { %3077 = vmatpush3.msra.mxu0 %v3972_v5  ;;  %v136_v22 = vand.u32 4294901760, %v3984_v15  ;;  %v143_v23 = vand.u32 4294901760, %v3987_v16  ;;  %v4009_v28 = vand.u32 4294901760, %v33_v19  ;;  %v4013_v30 = vsub.f32 %v36_v9, %v3980_v12  ;;  %v25_v50 = vld [vmem:[%s5410_s0] sm:$0xff]  ;;  %v27_v60 = vld [vmem:[#allocation2 + $0x8] sm:$0xff] }
  0x13   :  { %v150_v24 = vand.u32 4294901760, %v3992_v18  ;;  %3078 = vmatprep.subr.mxu0 %v3944_v0  ;;  %v157_v27 = vand.u32 4294901760, %v3996_v20  ;;  %v164_v29 = vand.u32 4294901760, %v3999_v21  ;;  %v4026_v34 = vsub.f32 %v35_v13, %v3989_v17  ;;  %v26_v7 = vld [vmem:[#allocation2] sm:$0xff] }
  0x14   :  { %3079 = vmatpush3.msra.mxu0 %v3974_v6  ;;  %v137_v31 = vsub.f32 %v3984_v15, %v136_v22  ;;  %v144_v32 = vsub.f32 %v3987_v16, %v143_v23  ;;  %v4029_v35 = vand.u32 4294901760, %v32_v26  ;;  %v171_v40 = vand.u32 4294901760, %v4013_v30 }
  0x15   :  { %v151_v33 = vsub.f32 %v3992_v18, %v150_v24  ;;  %3080 = vmatprep.subr.mxu0 %v3944_v0  ;;  %v158_v39 = vsub.f32 %v3996_v20, %v157_v27  ;;  %v165_v42 = vsub.f32 %v3999_v21, %v164_v29  ;;  %v4041_v43 = vsub.f32 %v34_v14, %v4005_v25 }
  0x16   :  { %3081 = vmatpush3.msra.mxu0 %v3976_v10  ;;  %v138_v37 = vand.u32 4294901760, %v137_v31  ;;  %v145_v38 = vand.u32 4294901760, %v144_v32  ;;  %v4044_v45 = vand.u32 4294901760, %v31_v36  ;;  %v178_v46 = vand.u32 4294901760, %v4026_v34 }
  0x17   :  { %3082 = vmatprep.subr.mxu0 %v3944_v0  ;;  %v152_v44 = vand.u32 4294901760, %v151_v33  ;;  %v4048_v47 = vsub.f32 %v33_v19, %v4009_v28  ;;  %v4052_v48 = vand.u32 4294901760, %v30_v41  ;;  %v159_v51 = vand.u32 4294901760, %v158_v39 }
  0x18   :  { %3083 = vmatpush3.msra.mxu0 %v3978_v11  ;;  %3110 = vmatpush3.msra.mxu1 %v138_v37  ;;  %v172_v52 = vsub.f32 %v4013_v30, %v171_v40  ;;  %v185_v53 = vand.u32 4294901760, %v4041_v43  ;;  %v4063_v55 = vsub.f32 %v32_v26, %v4029_v35  ;;  %v166_v56 = vand.u32 4294901760, %v165_v42 }
  0x19   :  { %3084 = vmatprep.subr.mxu0 %v3944_v0  ;;  %3111 = vmatprep.subr.mxu1 %v3944_v0  ;;  %v192_v57 = vand.u32 4294901760, %v4048_v47  ;;  %v179_v58 = vsub.f32 %v4026_v34, %v178_v46  ;;  %v4072_v59 = vand.u32 4294901760, %v29_v49  ;;  %v4075_v61 = vsub.f32 %v31_v36, %v4044_v45 }
  0x1a   :  { %3085 = vmatpush3.msra.mxu0 %v3980_v12  ;;  %3112 = vmatpush3.msra.mxu1 %v145_v38  ;;  %v4077_v62 = vand.u32 4294901760, %v25_v50  ;;  %v4081_v63 = vand.u32 4294901760, %v28_v54  ;;  %v173_v1 = vand.u32 4294901760, %v172_v52  ;;  %v186_v2 = vsub.f32 %v4041_v43, %v185_v53 }
  0x1b   :  { %3086 = vmatprep.subr.mxu0 %v3944_v0  ;;  %3113 = vmatprep.subr.mxu1 %v3944_v0  ;;  %v199_v3 = vand.u32 4294901760, %v4063_v55  ;;  %v4089_v8 = vsub.f32 %v30_v41, %v4052_v48  ;;  %v193_v9 = vsub.f32 %v4048_v47, %v192_v57  ;;  %v4096_v13 = vand.u32 4294901760, %v27_v60 }
  0x1c   :  { %3087 = vmatpush3.msra.mxu0 %v3989_v17  ;;  %3114 = vmatpush3.msra.mxu1 %v152_v44  ;;  %v180_v14 = vand.u32 4294901760, %v179_v58  ;;  %v206_v19 = vand.u32 4294901760, %v4075_v61  ;;  %v4101_v26 = vsub.f32 %v25_v50, %v4077_v62  ;;  %v4104_v31 = vsub.f32 %v29_v49, %v4072_v59 }
  0x1d   :  { %3088 = vmatprep.subr.mxu0 %v3944_v0  ;;  %3115 = vmatprep.subr.mxu1 %v3944_v0  ;;  %v4108_v32 = vand.u32 4294901760, %v26_v7  ;;  %v187_v33 = vand.u32 4294901760, %v186_v2  ;;  %v200_v36 = vsub.f32 %v4063_v55, %v199_v3  ;;  %v213_v37 = vand.u32 4294901760, %v4089_v8 }
  0x1e   :  { %3089 = vmatpush3.msra.mxu0 %v4005_v25  ;;  %3116 = vmatpush3.msra.mxu1 %v159_v51  ;;  %v4116_v38 = vsub.f32 %v28_v54, %v4081_v63  ;;  %v194_v39 = vand.u32 4294901760, %v193_v9  ;;  %v207_v41 = vsub.f32 %v4075_v61, %v206_v19  ;;  %v125_v42 = vand.u32 4294901760, %v4101_v26 }
  0x1f   :  { %3090 = vmatprep.subr.mxu0 %v3944_v0  ;;  %3117 = vmatprep.subr.mxu1 %v3944_v0  ;;  %v220_v44 = vand.u32 4294901760, %v4104_v31  ;;  %v4127_v49 = vsub.f32 %v27_v60, %v4096_v13  ;;  %v201_v50 = vand.u32 4294901760, %v200_v36  ;;  %v214_v51 = vsub.f32 %v4089_v8, %v213_v37 }
  0x20   :  { %3091 = vmatpush3.msra.mxu0 %v4009_v28  ;;  %3118 = vmatpush3.msra.mxu1 %v166_v56  ;;  %v227_v52 = vand.u32 4294901760, %v4116_v38  ;;  %v4137_v54 = vsub.f32 %v26_v7, %v4108_v32  ;;  %v208_v56 = vand.u32 4294901760, %v207_v41  ;;  %v126_v58 = vsub.f32 %v4101_v26, %v125_v42 }
  0x21   :  { %3092 = vmatprep.subr.mxu0 %v3944_v0  ;;  %3119 = vmatprep.subr.mxu1 %v3944_v0  ;;  %v221_v60 = vsub.f32 %v4104_v31, %v220_v44  ;;  %v215_v2 = vand.u32 4294901760, %v214_v51 }
  0x22   :  { %3093 = vmatpush3.msra.mxu0 %v4029_v35  ;;  %3120 = vmatpush3.msra.mxu1 %v173_v1  ;;  %v234_v1 = vand.u32 4294901760, %v4127_v49  ;;  %v228_v7 = vsub.f32 %v4116_v38, %v227_v52  ;;  %v241_v9 = vand.u32 4294901760, %v4137_v54 }
  0x23   :  { %3094 = vmatprep.subr.mxu0 %v3944_v0  ;;  %3121 = vmatprep.subr.mxu1 %v3944_v0 }
  0x24   :  { %3095 = vmatpush3.msra.mxu0 %v4044_v45  ;;  %3122 = vmatpush3.msra.mxu1 %v180_v14  ;;  %v127_v14 = vand.u32 4294901760, %v126_v58  ;;  %v235_v36 = vsub.f32 %v4127_v49, %v234_v1  ;;  %v242_v41 = vsub.f32 %v4137_v54, %v241_v9  ;;  %v691_v58 = vld [vmem:[#allocation2 + $0xb0] sm:$0xff] }
  0x25   :  { %3096 = vmatprep.subr.mxu0 %v3944_v0  ;;  %3123 = vmatprep.subr.mxu1 %v3944_v0 }
  0x26   :  { %3097 = vmatpush3.msra.mxu0 %v4052_v48  ;;  %3124 = vmatpush3.msra.mxu1 %v187_v33  ;;  %v222_v33 = vand.u32 4294901760, %v221_v60  ;;  %v243_v51 = vand.u32 4294901760, %v242_v41 }
  0x27   :  { %3098 = vmatprep.subr.mxu0 %v3944_v0  ;;  %3125 = vmatprep.subr.mxu1 %v3944_v0 }
  0x28   :  { %3099 = vmatpush3.msra.mxu0 %v4072_v59  ;;  %3126 = vmatpush3.msra.mxu1 %v194_v39  ;;  %v229_v39 = vand.u32 4294901760, %v228_v7  ;;  %v690_v7 = vld [vmem:[#allocation2 + $0xa8] sm:$0xff] }
  0x29   :  { %3100 = vmatprep.subr.mxu0 %v3944_v0  ;;  %3127 = vmatprep.subr.mxu1 %v3944_v0 }
  0x2a   :  { %3101 = vmatpush3.msra.mxu0 %v4081_v63  ;;  %3128 = vmatpush3.msra.mxu1 %v201_v50  ;;  %v236_v50 = vand.u32 4294901760, %v235_v36  ;;  %v689_v36 = vld [vmem:[#allocation2 + $0xa0] sm:$0xff] }
  0x2b   :  { %3102 = vmatprep.subr.mxu0 %v3944_v0  ;;  %3129 = vmatprep.subr.mxu1 %v3944_v0 }
  0x2c   :  { %3103 = vmatpush3.msra.mxu0 %v4096_v13  ;;  %3130 = vmatpush3.msra.mxu1 %v208_v56 }
  0x2d   :  { %3104 = vmatprep.subr.mxu0 %v3944_v0  ;;  %3131 = vmatprep.subr.mxu1 %v3944_v0 }
  0x2e   :  { %3105 = vmatpush3.msra.mxu0 %v4108_v32  ;;  %3132 = vmatpush3.msra.mxu1 %v215_v2  ;;  %v4436_v2 = vand.u32 4294901760, %v691_v58 }
  0x2f   :  { %3133 = vmatprep.subr.mxu1 %v3944_v0  ;;  %3144 = vmatprep.subr.mxu0 %v3944_v0 }
  0x30   :  { %3107 = vmatmul.mubr.f32.vlgmr.msra.gmra.mxu0 %v127_v14  ;;  %3134 = vmatpush3.msra.mxu1 %v222_v33  ;;  %v4442_v14 = vsub.f32 %v691_v58, %v4436_v2  ;;  %v4444_v33 = vand.u32 4294901760, %v690_v7 }
  0x31   :  { %3145 = vmatpush3.msra.mxu0 %v3984_v15  ;;  %3135 = vmatprep.subr.mxu1 %v3944_v0  ;;  %v697_v15 = vld [vmem:[#allocation2 + $0xe0] sm:$0xff] }
  0x32   :  { %3146 = vmatprep.subr.mxu0 %v3944_v0  ;;  %3136 = vmatpush3.msra.mxu1 %v229_v39  ;;  %v858_v41 = vand.u32 4294901760, %v4442_v14 }
  0x33   :  { %3147 = vmatpush3.msra.mxu0 %v3987_v16  ;;  %3137 = vmatprep.subr.mxu1 %v3944_v0  ;;  %v696_v16 = vld [vmem:[#allocation2 + $0xd8] sm:$0xff] }
  0x34   :  { %3148 = vmatprep.subr.mxu0 %v3944_v0  ;;  %3138 = vmatpush3.msra.mxu1 %v236_v50  ;;  %v4451_v50 = vsub.f32 %v690_v7, %v4444_v33 }
  0x35   :  { %3149 = vmatpush3.msra.mxu0 %v3992_v18  ;;  %3139 = vmatprep.subr.mxu1 %v3944_v0 }
  0x36   :  { %3150 = vmatprep.subr.mxu0 %v3944_v0  ;;  %3140 = vmatpush3.msra.mxu1 %v243_v51  ;;  %v4453_v51 = vand.u32 4294901760, %v689_v36 }
  0x37   :  { %3151 = vmatpush3.msra.mxu0 %v3996_v20  ;;  %3142 = vmatmul.mubr.f32.vlgmr.msra.gmra.mxu1 %v4077_v62 }
  0x38   :  { %3152 = vmatprep.subr.mxu0 %v3944_v0  ;;  %3179 = vmatprep.subr.mxu1 %v3944_v0 }
  0x39   :  { %3153 = vmatpush3.msra.mxu0 %v3999_v21  ;;  %3180 = vmatpush3.msra.mxu1 %v3970_v4  ;;  %v4351_v21 = vand.u32 4294901760, %v697_v15 }
  0x3a   :  { %3154 = vmatprep.subr.mxu0 %v3944_v0  ;;  %3181 = vmatprep.subr.mxu1 %v3944_v0 }
  0x3b   :  { %3155 = vmatpush3.msra.mxu0 %v4013_v30  ;;  %3182 = vmatpush3.msra.mxu1 %v3972_v5 }
  0x3c   :  { %3156 = vmatprep.subr.mxu0 %v3944_v0  ;;  %3183 = vmatprep.subr.mxu1 %v3944_v0 }
  0x3d   :  { %3157 = vmatpush3.msra.mxu0 %v4026_v34  ;;  %3184 = vmatpush3.msra.mxu1 %v3974_v6 }
  0x3e   :  { %3158 = vmatprep.subr.mxu0 %v3944_v0  ;;  %3185 = vmatprep.subr.mxu1 %v3944_v0 }
  0x3f   :  { %3159 = vmatpush3.msra.mxu0 %v4041_v43  ;;  %3186 = vmatpush3.msra.mxu1 %v3976_v10 }
  0x40   :  { %3160 = vmatprep.subr.mxu0 %v3944_v0  ;;  %3187 = vmatprep.subr.mxu1 %v3944_v0 }
  0x41   :  { %3161 = vmatpush3.msra.mxu0 %v4048_v47  ;;  %3188 = vmatpush3.msra.mxu1 %v3978_v11 }
  0x42   :  { %3162 = vmatprep.subr.mxu0 %v3944_v0  ;;  %3189 = vmatprep.subr.mxu1 %v3944_v0 }
  0x43   :  { %3163 = vmatpush3.msra.mxu0 %v4063_v55  ;;  %3190 = vmatpush3.msra.mxu1 %v3980_v12 }
  0x44   :  { %3164 = vmatprep.subr.mxu0 %v3944_v0  ;;  %3191 = vmatprep.subr.mxu1 %v3944_v0 }
  0x45   :  { %3165 = vmatpush3.msra.mxu0 %v4075_v61  ;;  %3192 = vmatpush3.msra.mxu1 %v3989_v17 }
  0x46   :  { %3166 = vmatprep.subr.mxu0 %v3944_v0  ;;  %3193 = vmatprep.subr.mxu1 %v3944_v0 }
  0x47   :  { %3167 = vmatpush3.msra.mxu0 %v4089_v8  ;;  %3194 = vmatpush3.msra.mxu1 %v4005_v25 }
  0x48   :  { %3168 = vmatprep.subr.mxu0 %v3944_v0  ;;  %3195 = vmatprep.subr.mxu1 %v3944_v0 }
  0x49   :  { %3169 = vmatpush3.msra.mxu0 %v4104_v31  ;;  %3196 = vmatpush3.msra.mxu1 %v4009_v28 }
  0x4a   :  { %3170 = vmatprep.subr.mxu0 %v3944_v0  ;;  %3197 = vmatprep.subr.mxu1 %v3944_v0 }
  0x4b   :  { %3171 = vmatpush3.msra.mxu0 %v4116_v38  ;;  %3198 = vmatpush3.msra.mxu1 %v4029_v35 }
  0x4c   :  { %3172 = vmatprep.subr.mxu0 %v3944_v0  ;;  %3199 = vmatprep.subr.mxu1 %v3944_v0 }
  0x4d   :  { %3173 = vmatpush3.msra.mxu0 %v4127_v49  ;;  %3200 = vmatpush3.msra.mxu1 %v4044_v45 }
  0x4e   :  { %3174 = vmatprep.subr.mxu0 %v3944_v0  ;;  %3201 = vmatprep.subr.mxu1 %v3944_v0 }
  0x4f   :  { %3175 = vmatpush3.msra.mxu0 %v4137_v54  ;;  %3176 = vmatprep.mubr.msk.f32.mxu0 %vm3945_vm0, %v3944_v0 }
  0x50   :  { %3202 = vmatpush3.msra.mxu1 %v4052_v48  ;;  %3177 = vmatmul.mubr.f32.vlgmr.msra.gmra.mxu0 %v4101_v26 }
  0x51   :  { %3203 = vmatprep.subr.mxu1 %v3944_v0  ;;  %3214 = vmatprep.subr.mxu0 %v3944_v0 }
  0x52   :  { %3204 = vmatpush3.msra.mxu1 %v4072_v59  ;;  %3215 = vmatpush3.msra.mxu0 %v136_v22  ;;  %v695_v22 = vld [vmem:[#allocation2 + $0xd0] sm:$0xff] }
  0x53   :  { %3205 = vmatprep.subr.mxu1 %v3944_v0  ;;  %3216 = vmatprep.subr.mxu0 %v3944_v0 }
  0x54   :  { %3206 = vmatpush3.msra.mxu1 %v4081_v63  ;;  %3217 = vmatpush3.msra.mxu0 %v143_v23  ;;  %v694_v23 = vld [vmem:[#allocation2 + $0xc8] sm:$0xff] }
  0x55   :  { %3207 = vmatprep.subr.mxu1 %v3944_v0  ;;  %3218 = vmatprep.subr.mxu0 %v3944_v0 }
  0x56   :  { %3208 = vmatpush3.msra.mxu1 %v4096_v13  ;;  %3219 = vmatpush3.msra.mxu0 %v150_v24  ;;  %v693_v24 = vld [vmem:[#allocation2 + $0xc0] sm:$0xff] }
  0x57   :  { %3209 = vmatprep.subr.mxu1 %v3944_v0  ;;  %3220 = vmatprep.subr.mxu0 %v3944_v0 }
  0x58   :  { %3210 = vmatpush3.msra.mxu1 %v4108_v32  ;;  %3211 = vmatprep.mubr.msk.f32.mxu1 %vm3945_vm0, %v3944_v0 }
  0x59   :  { %3221 = vmatpush3.msra.mxu0 %v157_v27  ;;  %3212 = vmatmul.mubr.f32.vlgmr.msra.gmra.mxu1 %v125_v42  ;;  %v4356_v27 = vand.u32 4294901760, %v695_v22 }
  0x5a   :  { %3222 = vmatprep.subr.mxu0 %v3944_v0  ;;  %3249 = vmatprep.subr.mxu1 %v3944_v0 }
  0x5b   :  { %3223 = vmatpush3.msra.mxu0 %v164_v29  ;;  %3250 = vmatpush3.msra.mxu1 %v3970_v4  ;;  %v700_v4 = vld [vmem:[#allocation2 + $0xf8] sm:$0xff]  ;;  %v4361_v29 = vand.u32 4294901760, %v693_v24 }
  0x5c   :  { %3224 = vmatprep.subr.mxu0 %v3944_v0  ;;  %3251 = vmatprep.subr.mxu1 %v3944_v0 }
  0x5d   :  { %3225 = vmatpush3.msra.mxu0 %v171_v40  ;;  %3252 = vmatpush3.msra.mxu1 %v3972_v5  ;;  %v4336_v5 = vand.u32 4294901760, %v700_v4  ;;  %v4371_v40 = vsub.f32 %v697_v15, %v4351_v21  ;;  %v4385_v47 = vsub.f32 %v693_v24, %v4361_v29  ;;  %v4463_v15 = vsub.f32 %v689_v36, %v4453_v51 }
  0x5e   :  { %3226 = vmatprep.subr.mxu0 %v3944_v0  ;;  %3253 = vmatprep.subr.mxu1 %v3944_v0 }
  0x5f   :  { %3227 = vmatpush3.msra.mxu0 %v178_v46  ;;  %3254 = vmatpush3.msra.mxu1 %v3974_v6  ;;  %v699_v6 = vld [vmem:[#allocation2 + $0xf0] sm:$0xff]  ;;  %v844_v31 = vand.u32 4294901760, %v4385_v47 }
  0x60   :  { %3228 = vmatprep.subr.mxu0 %v3944_v0  ;;  %3255 = vmatprep.subr.mxu1 %v3944_v0 }
  0x61   :  { %3229 = vmatpush3.msra.mxu0 %v185_v53  ;;  %3256 = vmatpush3.msra.mxu1 %v3976_v10  ;;  %v4339_v10 = vsub.f32 %v700_v4, %v4336_v5  ;;  %v845_v56 = vsub.f32 %v4385_v47, %v844_v31  ;;  %v688_v4 = vld [vmem:[#allocation2 + $0x98] sm:$0xff] }
  0x62   :  { %3230 = vmatprep.subr.mxu0 %v3944_v0  ;;  %3257 = vmatprep.subr.mxu1 %v3944_v0 }
  0x63   :  { %3231 = vmatpush3.msra.mxu0 %v192_v57  ;;  %3258 = vmatpush3.msra.mxu1 %v3978_v11  ;;  %v4341_v11 = vand.u32 4294901760, %v699_v6 }
  0x64   :  { %3232 = vmatprep.subr.mxu0 %v3944_v0  ;;  %3259 = vmatprep.subr.mxu1 %v3944_v0 }
  0x65   :  { %3233 = vmatpush3.msra.mxu0 %v199_v3  ;;  %3260 = vmatpush3.msra.mxu1 %v3980_v12  ;;  %v698_v12 = vld [vmem:[#allocation2 + $0xe8] sm:$0xff]  ;;  %v4347_v18 = vsub.f32 %v699_v6, %v4341_v11  ;;  %v859_v6 = vsub.f32 %v4442_v14, %v858_v41 }
  0x66   :  { %3234 = vmatprep.subr.mxu0 %v3944_v0  ;;  %3261 = vmatprep.subr.mxu1 %v3944_v0  ;;  %v4349_v20 = vand.u32 4294901760, %v698_v12 }
  0x67   :  { %3235 = vmatpush3.msra.mxu0 %v206_v19  ;;  %3262 = vmatpush3.msra.mxu1 %v3989_v17  ;;  %v795_v17 = vand.u32 4294901760, %v4339_v10  ;;  %v802_v34 = vand.u32 4294901760, %v4347_v18 }
  0x68   :  { %3236 = vmatprep.subr.mxu0 %v3944_v0  ;;  %3263 = vmatprep.subr.mxu1 %v3944_v0 }
  0x69   :  { %3237 = vmatpush3.msra.mxu0 %v213_v37  ;;  %3264 = vmatpush3.msra.mxu1 %v4005_v25  ;;  %v4354_v25 = vand.u32 4294901760, %v696_v16  ;;  %v796_v30 = vsub.f32 %v4339_v10, %v795_v17  ;;  %v803_v55 = vsub.f32 %v4347_v18, %v802_v34 }
  0x6a   :  { %3238 = vmatprep.subr.mxu0 %v3944_v0  ;;  %3265 = vmatprep.subr.mxu1 %v3944_v0 }
  0x6b   :  { %3239 = vmatpush3.msra.mxu0 %v220_v44  ;;  %3266 = vmatpush3.msra.mxu1 %v4009_v28  ;;  %v4359_v28 = vand.u32 4294901760, %v694_v23  ;;  %v4375_v43 = vsub.f32 %v696_v16, %v4354_v25  ;;  %v797_v53 = vand.u32 4294901760, %v796_v30  ;;  %v804_v3 = vand.u32 4294901760, %v803_v55  ;;  %v686_v55 = vld [vmem:[#allocation2 + $0x88] sm:$0xff] }
  0x6c   :  { %3240 = vmatprep.subr.mxu0 %v3944_v0  ;;  %3267 = vmatprep.subr.mxu1 %v3944_v0  ;;  %v4465_v16 = vand.u32 4294901760, %v688_v4  ;;  %v872_v30 = vand.u32 4294901760, %v4463_v15 }
  0x6d   :  { %3241 = vmatpush3.msra.mxu0 %v227_v52  ;;  %3268 = vmatpush3.msra.mxu1 %v4029_v35  ;;  %v4368_v35 = vsub.f32 %v698_v12, %v4349_v20  ;;  %v4381_v46 = vsub.f32 %v694_v23, %v4359_v28  ;;  %v823_v61 = vand.u32 4294901760, %v4375_v43  ;;  %v865_v12 = vand.u32 4294901760, %v4451_v50 }
  0x6e   :  { %3242 = vmatprep.subr.mxu0 %v3944_v0  ;;  %3269 = vmatprep.subr.mxu1 %v3944_v0  ;;  %v860_v23 = vand.u32 4294901760, %v859_v6 }
  0x6f   :  { %3243 = vmatpush3.msra.mxu0 %v234_v1  ;;  %3270 = vmatpush3.msra.mxu1 %v4044_v45  ;;  %v4378_v45 = vsub.f32 %v695_v22, %v4356_v27  ;;  %v809_v57 = vand.u32 4294901760, %v4368_v35  ;;  %v824_v26 = vsub.f32 %v4375_v43, %v823_v61  ;;  %v687_v22 = vld [vmem:[#allocation2 + $0x90] sm:$0xff]  ;;  %v866_v24 = vsub.f32 %v4451_v50, %v865_v12 }
  0x70   :  { %3244 = vmatprep.subr.mxu0 %v3944_v0  ;;  %3271 = vmatprep.subr.mxu1 %v3944_v0 }
  0x71   :  { %3245 = vmatpush3.msra.mxu0 %v241_v9  ;;  %3246 = vmatprep.mubr.msk.f32.mxu0 %vm3945_vm0, %v3944_v0  ;;  %v810_v8 = vsub.f32 %v4368_v35, %v809_v57  ;;  %v825_v44 = vand.u32 4294901760, %v824_v26  ;;  %v846_v9 = vand.u32 4294901760, %v845_v56  ;;  %v4486_v26 = vand.u32 4294901760, %v686_v55 }
  0x72   :  { %3272 = vmatpush3.msra.mxu1 %v4052_v48  ;;  %3247 = vmatmul.mubr.f32.vlgmr.msra.gmra.mxu0 %v4077_v62  ;;  %v692_v48 = vld [vmem:[#allocation2 + $0xb8] sm:$0xff] }
  0x73   :  { %3273 = vmatprep.subr.mxu1 %v3944_v0  ;;  %3281 = vmatprep.mubr.msk.f32.mxu1 %vm3945_vm0, %v3944_v0  ;;  %v4404_v19 = vand.u32 4294901760, %v692_v48 }
  0x74   :  { %3274 = vmatpush3.msra.mxu1 %v4072_v59  ;;  %3284 = vmatprep.subr.mxu0 %v3944_v0  ;;  %v816_v59 = vand.u32 4294901760, %v4371_v40 }
  0x75   :  { %3275 = vmatprep.subr.mxu1 %v3944_v0  ;;  %3316 = vmatprep.mubr.msk.f32.mxu0 %vm3945_vm0, %v3944_v0  ;;  %v4415_v42 = vsub.f32 %v692_v48, %v4404_v19  ;;  %v4475_v48 = vsub.f32 %v688_v4, %v4465_v16 }
  0x76   :  { %3276 = vmatpush3.msra.mxu1 %v4081_v63  ;;  %3285 = vmatpush3.msra.mxu0 %v4336_v5  ;;  %v837_v63 = vand.u32 4294901760, %v4381_v46 }
  0x77   :  { %3277 = vmatprep.subr.mxu1 %v3944_v0  ;;  %3286 = vmatprep.subr.mxu0 %v3944_v0  ;;  %v851_v52 = vand.u32 4294901760, %v4415_v42 }
  0x78   :  { %3278 = vmatpush3.msra.mxu1 %v4096_v13  ;;  %3287 = vmatpush3.msra.mxu0 %v4341_v11  ;;  %v817_v13 = vsub.f32 %v4371_v40, %v816_v59  ;;  %v838_v49 = vsub.f32 %v4381_v46, %v837_v63 }
  0x79   :  { %3279 = vmatprep.subr.mxu1 %v3944_v0  ;;  %3288 = vmatprep.subr.mxu0 %v3944_v0  ;;  %v852_v1 = vsub.f32 %v4415_v42, %v851_v52 }
  0x7a   :  { %3280 = vmatpush3.msra.mxu1 %v4108_v32  ;;  %3289 = vmatpush3.msra.mxu0 %v4349_v20  ;;  %v811_v32 = vand.u32 4294901760, %v810_v8  ;;  %v818_v37 = vand.u32 4294901760, %v817_v13  ;;  %v839_v60 = vand.u32 4294901760, %v838_v49  ;;  %v873_v8 = vsub.f32 %v4463_v15, %v872_v30 }
  0x7b   :  { %3282 = vmatmul.mubr.f32.vlgmr.msra.gmra.mxu1 %v4077_v62  ;;  %3319 = vmatprep.subr.mxu1 %v3944_v0  ;;  %v830_v62 = vand.u32 4294901760, %v4378_v45  ;;  %v853_v39 = vand.u32 4294901760, %v852_v1  ;;  %v5416_v13 = vand.u32 4294901760, %v4475_v48  ;;  %v4498_v49 = vsub.f32 %v686_v55, %v4486_v26 }
  0x7c   :  { %3351 = vmatprep.mubr.msk.f32.mxu1 %vm3945_vm0, %v3944_v0  ;;  %3290 = vmatprep.subr.mxu0 %v3944_v0 }
  0x7d   :  { %3291 = vmatpush3.msra.mxu0 %v4351_v21  ;;  %3320 = vmatpush3.msra.mxu1 %v797_v53  ;;  %v831_v38 = vsub.f32 %v4378_v45, %v830_v62  ;;  %v4479_v53 = vand.u32 4294901760, %v687_v22 }
  0x7e   :  { %3292 = vmatprep.subr.mxu0 %v3944_v0  ;;  %3321 = vmatprep.subr.mxu1 %v3944_v0 }
  0x7f   :  { %3293 = vmatpush3.msra.mxu0 %v4354_v25  ;;  %3322 = vmatpush3.msra.mxu1 %v804_v3  ;;  %v832_v54 = vand.u32 4294901760, %v831_v38  ;;  %v867_v3 = vand.u32 4294901760, %v866_v24  ;;  %v874_v38 = vand.u32 4294901760, %v873_v8 }
  0x80   :  { %3294 = vmatprep.subr.mxu0 %v3944_v0  ;;  %3323 = vmatprep.subr.mxu1 %v3944_v0 }
  0x81   :  { %3295 = vmatpush3.msra.mxu0 %v4356_v27  ;;  %3324 = vmatpush3.msra.mxu1 %v811_v32  ;;  %v4491_v32 = vsub.f32 %v687_v22, %v4479_v53 }
  0x82   :  { %3296 = vmatprep.subr.mxu0 %v3944_v0  ;;  %3325 = vmatprep.subr.mxu1 %v3944_v0 }
  0x83   :  { %3297 = vmatpush3.msra.mxu0 %v4359_v28  ;;  %3326 = vmatpush3.msra.mxu1 %v818_v37  ;;  %v685_v37 = vld [vmem:[#allocation2 + $0x80] sm:$0xff]  ;;  %v5415_v56 = vand.u32 4294901760, %v4491_v32 }
  0x84   :  { %3298 = vmatprep.subr.mxu0 %v3944_v0  ;;  %3327 = vmatprep.subr.mxu1 %v3944_v0 }
  0x85   :  { %3299 = vmatpush3.msra.mxu0 %v4361_v29  ;;  %3328 = vmatpush3.msra.mxu1 %v825_v44  ;;  %v880_v44 = vsub.f32 %v4475_v48, %v5416_v13  ;;  %v887_v7 = vsub.f32 %v4491_v32, %v5415_v56 }
  0x86   :  { %3300 = vmatprep.subr.mxu0 %v3944_v0  ;;  %3329 = vmatprep.subr.mxu1 %v3944_v0 }
  0x87   :  { %3301 = vmatpush3.msra.mxu0 %v4404_v19  ;;  %3330 = vmatpush3.msra.mxu1 %v832_v54  ;;  %v4500_v54 = vand.u32 4294901760, %v685_v37  ;;  %v881_v58 = vand.u32 4294901760, %v880_v44 }
  0x88   :  { %3302 = vmatprep.subr.mxu0 %v3944_v0  ;;  %3331 = vmatprep.subr.mxu1 %v3944_v0 }
  0x89   :  { %3303 = vmatpush3.msra.mxu0 %v4436_v2  ;;  %3332 = vmatpush3.msra.mxu1 %v839_v60  ;;  %v5414_v60 = vand.u32 4294901760, %v4498_v49  ;;  %v4508_v1 = vsub.f32 %v685_v37, %v4500_v54 }
  0x8a   :  { %3304 = vmatprep.subr.mxu0 %v3944_v0  ;;  %3333 = vmatprep.subr.mxu1 %v3944_v0 }
  0x8b   :  { %3305 = vmatpush3.msra.mxu0 %v4444_v33  ;;  %3334 = vmatpush3.msra.mxu1 %v846_v9  ;;  %v894_v9 = vsub.f32 %v4498_v49, %v5414_v60  ;;  %v5413_v36 = vand.u32 4294901760, %v4508_v1 }
  0x8c   :  { %3306 = vmatprep.subr.mxu0 %v3944_v0  ;;  %3335 = vmatprep.subr.mxu1 %v3944_v0 }
  0x8d   :  { %3307 = vmatpush3.msra.mxu0 %v4453_v51  ;;  %3336 = vmatpush3.msra.mxu1 %v853_v39  ;;  %v888_v39 = vand.u32 4294901760, %v887_v7  ;;  %v895_v4 = vand.u32 4294901760, %v894_v9  ;;  %v901_v6 = vsub.f32 %v4508_v1, %v5413_v36 }
  0x8e   :  { %3308 = vmatprep.subr.mxu0 %v3944_v0  ;;  %3337 = vmatprep.subr.mxu1 %v3944_v0 }
  0x8f   :  { %3309 = vmatpush3.msra.mxu0 %v4465_v16  ;;  %3338 = vmatpush3.msra.mxu1 %v860_v23  ;;  %v902_v22 = vand.u32 4294901760, %v901_v6 }
  0x90   :  { %3310 = vmatprep.subr.mxu0 %v3944_v0  ;;  %3339 = vmatprep.subr.mxu1 %v3944_v0 }
  0x91   :  { %3311 = vmatpush3.msra.mxu0 %v4479_v53  ;;  %3340 = vmatpush3.msra.mxu1 %v867_v3 }
  0x92   :  { %3312 = vmatprep.subr.mxu0 %v3944_v0  ;;  %3341 = vmatprep.subr.mxu1 %v3944_v0 }
  0x93   :  { %3313 = vmatpush3.msra.mxu0 %v4486_v26  ;;  %3342 = vmatpush3.msra.mxu1 %v874_v38 }
  0x94   :  { %3314 = vmatprep.subr.mxu0 %v3944_v0  ;;  %3343 = vmatprep.subr.mxu1 %v3944_v0 }
  0x95   :  { %3315 = vmatpush3.msra.mxu0 %v4500_v54  ;;  %3344 = vmatpush3.msra.mxu1 %v881_v58 }
  0x96   :  { %3354 = vmatprep.subr.mxu0 %v3944_v0  ;;  %3345 = vmatprep.subr.mxu1 %v3944_v0 }
  0x97   :  { %3346 = vmatpush3.msra.mxu1 %v888_v39 }
  0x98   :  { %3347 = vmatprep.subr.mxu1 %v3944_v0 }
  0x99   :  { %3348 = vmatpush3.msra.mxu1 %v895_v4 }
  0x9a   :  { %3349 = vmatprep.subr.mxu1 %v3944_v0 }
  0x9b   :  { %3350 = vmatpush3.msra.mxu1 %v902_v22 }
  0x9c   :  { %3389 = vmatprep.subr.mxu1 %v3944_v0 }
  0xf0   :  { %v129_v23 = vpop.f32.mrf.mxu0 }
  0xf2   :  { %v3108_v24 = vpop.f32.mrf.mxu0 }
  0xf7   :  { %v280_v55 = vpop.f32.mrf.mxu1 }
  0xf8   :  { %v281_v7 = vadd.f32 %v280_v55, %v129_v23 }
  0xf9   :  { %v3143_v3 = vpop.f32.mrf.mxu1 }
 0x110   :  { %v384_v8 = vpop.f32.mrf.mxu0 }
 0x111   :  { %v385_v39 = vadd.f32 %v384_v8, %v281_v7  ;;  %v1351_v8 = vld [vmem:[#allocation2 + $0x138] sm:$0xff] }
 0x112   :  { %v3178_v37 = vpop.f32.mrf.mxu0 }
 0x119   :  { %v473_v38 = vpop.f32.mrf.mxu1 }
 0x11a   :  { %v474_v36 = vadd.f32 %v473_v38, %v385_v39 }
 0x11b   :  { %v3213_v44 = vpop.f32.mrf.mxu1 }
 0x11c   :  { %v4784_v44 = vand.u32 4294901760, %v1351_v8 }
 0x132   :  { %v592_v58 = vpop.f32.mrf.mxu0 }
 0x133   :  { %v593_v6 = vadd.f32 %v592_v58, %v474_v36  ;;  %v1350_v58 = vld [vmem:[#allocation2 + $0x130] sm:$0xff] }
 0x134   :  { %v3248_v9 = vpop.f32.mrf.mxu0  ;;  %v4792_v39 = vand.u32 4294901760, %v1350_v58 }
 0x135   :  { %v4790_v9 = vsub.f32 %v1351_v8, %v4784_v44 }
 0x13b   :  { %v679_v4 = vpop.f32.mrf.mxu1 }
 0x13c   :  { %v680_v60 = vadd.f32 %v679_v4, %v593_v6  ;;  %v1349_v6 = vld [vmem:[#allocation2 + $0x128] sm:$0xff] }
 0x13d   :  { %v3283_v56 = vpop.f32.mrf.mxu1 }
 0x13e   :  { %v683_v22 = vmax.f32 %v680_v60, 0.0 }
 0x140   :  { %v4528_v13 = vand.u32 4294901760, %v683_v22 }
 0x142   :  { %v4531_v24 = vsub.f32 %v683_v22, %v4528_v13  ;;  %3352 = vmatmul.mubr.f32.vlgmr.msra.gmra.mxu1 %v4528_v13  ;;  %v1510_v22 = vand.u32 4294901760, %v4790_v9 }
 0x143   :  { %3390 = vmatpush3.msra.mxu1 %v4336_v5  ;;  %3421 = vmatprep.mubr.msk.f32.mxu1 %vm3945_vm0, %v3944_v0 }
 0x144   :  { %v784_v23 = vand.u32 4294901760, %v4531_v24  ;;  %3391 = vmatprep.subr.mxu1 %v3944_v0 }
 0x145   :  { %3392 = vmatpush3.msra.mxu1 %v4341_v11 }
 0x146   :  { %v785_v56 = vsub.f32 %v4531_v24, %v784_v23  ;;  %3393 = vmatprep.subr.mxu1 %v3944_v0 }
 0x147   :  { %3394 = vmatpush3.msra.mxu1 %v4349_v20 }
 0x148   :  { %3395 = vmatprep.subr.mxu1 %v3944_v0  ;;  %v786_v60 = vand.u32 4294901760, %v785_v56  ;;  %v1348_v56 = vld [vmem:[#allocation2 + $0x120] sm:$0xff] }
 0x149   :  { %3396 = vmatpush3.msra.mxu1 %v4351_v21 }
 0x14a   :  { %3397 = vmatprep.subr.mxu1 %v3944_v0  ;;  %3317 = vmatmul.mubr.f32.vlgmr.msra.gmra.mxu0 %v786_v60  ;;  %v1511_v60 = vsub.f32 %v4790_v9, %v1510_v22 }
 0x14b   :  { %3355 = vmatpush3.msra.mxu0 %v4339_v10  ;;  %3398 = vmatpush3.msra.mxu1 %v4354_v25  ;;  %v5426_v10 = vand.u32 4294901760, %v4491_v32 }
 0x14c   :  { %3356 = vmatprep.subr.mxu0 %v3944_v0  ;;  %3399 = vmatprep.subr.mxu1 %v3944_v0 }
 0x14d   :  { %3357 = vmatpush3.msra.mxu0 %v4347_v18  ;;  %3400 = vmatpush3.msra.mxu1 %v4356_v27  ;;  %v1359_v18 = vld [vmem:[#allocation2 + $0x178] sm:$0xff] }
 0x14e   :  { %3358 = vmatprep.subr.mxu0 %v3944_v0  ;;  %3401 = vmatprep.subr.mxu1 %v3944_v0 }
 0x14f   :  { %3359 = vmatpush3.msra.mxu0 %v4368_v35  ;;  %3402 = vmatpush3.msra.mxu1 %v4359_v28 }
 0x150   :  { %3360 = vmatprep.subr.mxu0 %v3944_v0  ;;  %3403 = vmatprep.subr.mxu1 %v3944_v0 }
 0x151   :  { %3361 = vmatpush3.msra.mxu0 %v4371_v40  ;;  %3404 = vmatpush3.msra.mxu1 %v4361_v29 }
 0x152   :  { %3362 = vmatprep.subr.mxu0 %v3944_v0  ;;  %3405 = vmatprep.subr.mxu1 %v3944_v0 }
 0x153   :  { %3363 = vmatpush3.msra.mxu0 %v4375_v43  ;;  %3406 = vmatpush3.msra.mxu1 %v4404_v19 }
 0x154   :  { %3364 = vmatprep.subr.mxu0 %v3944_v0  ;;  %3407 = vmatprep.subr.mxu1 %v3944_v0 }
 0x155   :  { %3365 = vmatpush3.msra.mxu0 %v4378_v45  ;;  %3408 = vmatpush3.msra.mxu1 %v4436_v2  ;;  %v1354_v45 = vld [vmem:[#allocation2 + $0x150] sm:$0xff] }
 0x156   :  { %3366 = vmatprep.subr.mxu0 %v3944_v0  ;;  %3409 = vmatprep.subr.mxu1 %v3944_v0 }
 0x157   :  { %3367 = vmatpush3.msra.mxu0 %v4381_v46  ;;  %3410 = vmatpush3.msra.mxu1 %v4444_v33  ;;  %v1353_v46 = vld [vmem:[#allocation2 + $0x148] sm:$0xff] }
 0x158   :  { %3368 = vmatprep.subr.mxu0 %v3944_v0  ;;  %3411 = vmatprep.subr.mxu1 %v3944_v0 }
 0x159   :  { %3369 = vmatpush3.msra.mxu0 %v4385_v47  ;;  %3412 = vmatpush3.msra.mxu1 %v4453_v51  ;;  %v1352_v47 = vld [vmem:[#allocation2 + $0x140] sm:$0xff] }
 0x15a   :  { %3370 = vmatprep.subr.mxu0 %v3944_v0  ;;  %3413 = vmatprep.subr.mxu1 %v3944_v0 }
 0x15b   :  { %3371 = vmatpush3.msra.mxu0 %v4415_v42  ;;  %3414 = vmatpush3.msra.mxu1 %v4465_v16  ;;  %v4729_v42 = vand.u32 4294901760, %v1352_v47 }
 0x15c   :  { %3372 = vmatprep.subr.mxu0 %v3944_v0  ;;  %3415 = vmatprep.subr.mxu1 %v3944_v0 }
 0x15d   :  { %3373 = vmatpush3.msra.mxu0 %v4442_v14  ;;  %3416 = vmatpush3.msra.mxu1 %v4479_v53 }
 0x15e   :  { %3374 = vmatprep.subr.mxu0 %v3944_v0  ;;  %3417 = vmatprep.subr.mxu1 %v3944_v0 }
 0x15f   :  { %3375 = vmatpush3.msra.mxu0 %v4451_v50  ;;  %3418 = vmatpush3.msra.mxu1 %v4486_v26 }
 0x160   :  { %3376 = vmatprep.subr.mxu0 %v3944_v0  ;;  %3419 = vmatprep.subr.mxu1 %v3944_v0 }
 0x161   :  { %3377 = vmatpush3.msra.mxu0 %v4463_v15  ;;  %3420 = vmatpush3.msra.mxu1 %v4500_v54 }
 0x162   :  { %3378 = vmatprep.subr.mxu0 %v3944_v0  ;;  %3422 = vmatmul.mubr.f32.vlgmr.msra.gmra.mxu1 %v784_v23  ;;  %v4801_v23 = vand.u32 4294901760, %v1349_v6 }
 0x163   :  { %3459 = vmatprep.subr.mxu1 %v3944_v0  ;;  %3379 = vmatpush3.msra.mxu0 %v4475_v48 }
 0x164   :  { %3460 = vmatpush3.msra.mxu1 %v4336_v5  ;;  %3380 = vmatprep.subr.mxu0 %v3944_v0  ;;  %v5425_v5 = vand.u32 4294901760, %v4475_v48 }
 0x165   :  { %3461 = vmatprep.subr.mxu1 %v3944_v0  ;;  %3381 = vmatpush3.msra.mxu0 %v4491_v32 }
 0x166   :  { %3462 = vmatpush3.msra.mxu1 %v4341_v11  ;;  %3382 = vmatprep.subr.mxu0 %v3944_v0  ;;  %v5427_v11 = vand.u32 4294901760, %v4498_v49 }
 0x167   :  { %3463 = vmatprep.subr.mxu1 %v3944_v0  ;;  %3383 = vmatpush3.msra.mxu0 %v4498_v49 }
 0x168   :  { %3464 = vmatpush3.msra.mxu1 %v4349_v20  ;;  %3384 = vmatprep.subr.mxu0 %v3944_v0  ;;  %v4695_v20 = vand.u32 4294901760, %v1359_v18 }
 0x169   :  { %3465 = vmatprep.subr.mxu1 %v3944_v0  ;;  %3385 = vmatpush3.msra.mxu0 %v4508_v1 }
 0x16a   :  { %3386 = vmatprep.mubr.msk.f32.mxu0 %vm3945_vm0, %v3944_v0  ;;  %3466 = vmatpush3.msra.mxu1 %v4351_v21  ;;  %v1358_v21 = vld [vmem:[#allocation2 + $0x170] sm:$0xff] }
 0x16b   :  { %3387 = vmatmul.mubr.f32.vlgmr.msra.gmra.mxu0 %v4531_v24  ;;  %3424 = vmatprep.subr.mxu0 %v3944_v0  ;;  %v4799_v24 = vsub.f32 %v1350_v58, %v4792_v39 }
 0x16c   :  { %3467 = vmatprep.subr.mxu1 %v3944_v0  ;;  %3425 = vmatpush3.msra.mxu0 %v795_v17  ;;  %v5428_v17 = vand.u32 4294901760, %v4508_v1 }
 0x16d   :  { %3468 = vmatpush3.msra.mxu1 %v4354_v25  ;;  %3426 = vmatprep.subr.mxu0 %v3944_v0  ;;  %v4698_v25 = vsub.f32 %v1359_v18, %v4695_v20  ;;  %v1512_v18 = vand.u32 4294901760, %v1511_v60 }
 0x16e   :  { %3469 = vmatprep.subr.mxu1 %v3944_v0  ;;  %3427 = vmatpush3.msra.mxu0 %v802_v34  ;;  %v1355_v34 = vld [vmem:[#allocation2 + $0x158] sm:$0xff] }
 0x16f   :  { %3470 = vmatpush3.msra.mxu1 %v4356_v27  ;;  %3428 = vmatprep.subr.mxu0 %v3944_v0  ;;  %v4700_v27 = vand.u32 4294901760, %v1358_v21  ;;  %v4707_v43 = vand.u32 4294901760, %v1355_v34 }
 0x170   :  { %3471 = vmatprep.subr.mxu1 %v3944_v0  ;;  %3429 = vmatpush3.msra.mxu0 %v809_v57  ;;  %v1454_v57 = vand.u32 4294901760, %v4698_v25 }
 0x171   :  { %3472 = vmatpush3.msra.mxu1 %v4359_v28  ;;  %3430 = vmatprep.subr.mxu0 %v3944_v0  ;;  %v1357_v28 = vld [vmem:[#allocation2 + $0x168] sm:$0xff] }
 0x172   :  { %3473 = vmatprep.subr.mxu1 %v3944_v0  ;;  %3431 = vmatpush3.msra.mxu0 %v816_v59  ;;  %v4703_v35 = vand.u32 4294901760, %v1357_v28  ;;  %v4712_v59 = vsub.f32 %v1358_v21, %v4700_v27 }
 0x173   :  { %3474 = vmatpush3.msra.mxu1 %v4361_v29  ;;  %3432 = vmatprep.subr.mxu0 %v3944_v0  ;;  %v1356_v29 = vld [vmem:[#allocation2 + $0x160] sm:$0xff] }
 0x174   :  { %3475 = vmatprep.subr.mxu1 %v3944_v0  ;;  %3433 = vmatpush3.msra.mxu0 %v823_v61  ;;  %v4705_v40 = vand.u32 4294901760, %v1356_v29  ;;  %v4715_v61 = vand.u32 4294901760, %v1354_v45 }
 0x175   :  { %3476 = vmatpush3.msra.mxu1 %v4404_v19  ;;  %3434 = vmatprep.subr.mxu0 %v3944_v0 }
 0x176   :  { %3477 = vmatprep.subr.mxu1 %v3944_v0  ;;  %3435 = vmatpush3.msra.mxu0 %v830_v62  ;;  %v4717_v62 = vand.u32 4294901760, %v1353_v46  ;;  %v4723_v19 = vsub.f32 %v1356_v29, %v4705_v40  ;;  %v4736_v14 = vsub.f32 %v1354_v45, %v4715_v61  ;;  %v1346_v45 = vld [vmem:[#allocation2 + $0x110] sm:$0xff] }
 0x177   :  { %3478 = vmatpush3.msra.mxu1 %v4436_v2  ;;  %3436 = vmatprep.subr.mxu0 %v3944_v0  ;;  %v1461_v2 = vand.u32 4294901760, %v4712_v59 }
 0x178   :  { %3479 = vmatprep.subr.mxu1 %v3944_v0  ;;  %3437 = vmatpush3.msra.mxu0 %v837_v63  ;;  %v4720_v63 = vsub.f32 %v1357_v28, %v4703_v35  ;;  %v1475_v50 = vand.u32 4294901760, %v4723_v19 }
 0x179   :  { %3480 = vmatpush3.msra.mxu1 %v4444_v33  ;;  %3438 = vmatprep.subr.mxu0 %v3944_v0  ;;  %v4740_v33 = vsub.f32 %v1353_v46, %v4717_v62  ;;  %v1462_v15 = vsub.f32 %v4712_v59, %v1461_v2 }
 0x17a   :  { %3481 = vmatprep.subr.mxu1 %v3944_v0  ;;  %3439 = vmatpush3.msra.mxu0 %v844_v31  ;;  %v4726_v31 = vsub.f32 %v1355_v34, %v4707_v43 }
 0x17b   :  { %3482 = vmatpush3.msra.mxu1 %v4453_v51  ;;  %3440 = vmatprep.subr.mxu0 %v3944_v0  ;;  %v1496_v32 = vand.u32 4294901760, %v4740_v33 }
 0x17c   :  { %3483 = vmatprep.subr.mxu1 %v3944_v0  ;;  %3441 = vmatpush3.msra.mxu0 %v851_v52  ;;  %v1455_v52 = vsub.f32 %v4698_v25, %v1454_v57  ;;  %v1482_v51 = vand.u32 4294901760, %v4726_v31 }
 0x17d   :  { %3484 = vmatpush3.msra.mxu1 %v4465_v16  ;;  %3442 = vmatprep.subr.mxu0 %v3944_v0  ;;  %v1489_v16 = vand.u32 4294901760, %v4736_v14  ;;  %v1497_v3 = vsub.f32 %v4740_v33, %v1496_v32 }
 0x17e   :  { %3485 = vmatprep.subr.mxu1 %v3944_v0  ;;  %3443 = vmatpush3.msra.mxu0 %v858_v41  ;;  %v1468_v41 = vand.u32 4294901760, %v4720_v63 }
 0x17f   :  { %3486 = vmatpush3.msra.mxu1 %v4479_v53  ;;  %3444 = vmatprep.subr.mxu0 %v3944_v0  ;;  %v1476_v53 = vsub.f32 %v4723_v19, %v1475_v50  ;;  %v1490_v1 = vsub.f32 %v4736_v14, %v1489_v16  ;;  %v1498_v7 = vand.u32 4294901760, %v1497_v3 }
 0x180   :  { %3487 = vmatprep.subr.mxu1 %v3944_v0  ;;  %3445 = vmatpush3.msra.mxu0 %v865_v12  ;;  %v1456_v12 = vand.u32 4294901760, %v1455_v52  ;;  %v1469_v48 = vsub.f32 %v4720_v63, %v1468_v41 }
 0x181   :  { %3488 = vmatpush3.msra.mxu1 %v4486_v26  ;;  %3446 = vmatprep.subr.mxu0 %v3944_v0  ;;  %v1483_v26 = vsub.f32 %v4726_v31, %v1482_v51  ;;  %v1491_v37 = vand.u32 4294901760, %v1490_v1  ;;  %v1344_v1 = vld [vmem:[#allocation2 + $0x100] sm:$0xff] }
 0x182   :  { %3489 = vmatprep.subr.mxu1 %v3944_v0  ;;  %3447 = vmatpush3.msra.mxu0 %v872_v30  ;;  %v4752_v30 = vsub.f32 %v1352_v47, %v4729_v42  ;;  %v1470_v49 = vand.u32 4294901760, %v1469_v48  ;;  %v1345_v48 = vld [vmem:[#allocation2 + $0x108] sm:$0xff] }
 0x183   :  { %3490 = vmatpush3.msra.mxu1 %v4500_v54  ;;  %3491 = vmatprep.mubr.msk.f32.mxu1 %vm3945_vm0, %v3944_v0  ;;  %v1477_v54 = vand.u32 4294901760, %v1476_v53  ;;  %v1484_v55 = vand.u32 4294901760, %v1483_v26 }
 0x184   :  { %3448 = vmatprep.subr.mxu0 %v3944_v0  ;;  %3492 = vmatmul.mubr.f32.vlgmr.msra.gmra.mxu1 %v4528_v13  ;;  %v1503_v36 = vand.u32 4294901760, %v4752_v30 }
 0x185   :  { %3449 = vmatpush3.msra.mxu0 %v5425_v5  ;;  %3456 = vmatprep.mubr.msk.f32.mxu0 %vm3945_vm0, %v3944_v0  ;;  %v1517_v5 = vand.u32 4294901760, %v4799_v24 }
 0x186   :  { %3450 = vmatprep.subr.mxu0 %v3944_v0  ;;  %3529 = vmatprep.subr.mxu1 %v3944_v0  ;;  %v1504_v38 = vsub.f32 %v4752_v30, %v1503_v36 }
 0x187   :  { %3451 = vmatpush3.msra.mxu0 %v5426_v10  ;;  %3561 = vmatprep.mubr.msk.f32.mxu1 %vm3945_vm0, %v3944_v0  ;;  %v4811_v10 = vsub.f32 %v1349_v6, %v4801_v23  ;;  %v1518_v21 = vsub.f32 %v4799_v24, %v1517_v5 }
 0x188   :  { %3452 = vmatprep.subr.mxu0 %v3944_v0  ;;  %3530 = vmatpush3.msra.mxu1 %v1456_v12  ;;  %v1505_v4 = vand.u32 4294901760, %v1504_v38  ;;  %v4834_v12 = vand.u32 4294901760, %v1346_v45 }
 0x189   :  { %3453 = vmatpush3.msra.mxu0 %v5427_v11  ;;  %3531 = vmatprep.subr.mxu1 %v3944_v0  ;;  %v4813_v11 = vand.u32 4294901760, %v1348_v56  ;;  %v1524_v28 = vand.u32 4294901760, %v4811_v10  ;;  %v1519_v46 = vand.u32 4294901760, %v1518_v21 }
 0x18a   :  { %3454 = vmatprep.subr.mxu0 %v3944_v0  ;;  %v4845_v26 = vsub.f32 %v1346_v45, %v4834_v12 }
 0x18b   :  { %3455 = vmatpush3.msra.mxu0 %v5428_v17  ;;  %v1347_v17 = vld [vmem:[#allocation2 + $0x118] sm:$0xff]  ;;  %v4823_v29 = vsub.f32 %v1348_v56, %v4813_v11  ;;  %v1525_v47 = vsub.f32 %v4811_v10, %v1524_v28 }
 0x18c   :  { %3457 = vmatmul.mubr.f32.vlgmr.msra.gmra.mxu0 %v4528_v13  ;;  %3494 = vmatprep.subr.mxu0 %v3944_v0  ;;  %v1463_v13 = vand.u32 4294901760, %v1462_v15  ;;  %v4827_v34 = vand.u32 4294901760, %v1347_v17  ;;  %v5419_v3 = vand.u32 4294901760, %v4845_v26 }
 0x18d   :  { %3526 = vmatprep.mubr.msk.f32.mxu0 %vm3945_vm0, %v3944_v0  ;;  %3495 = vmatpush3.msra.mxu0 %v4695_v20  ;;  %v1531_v52 = vand.u32 4294901760, %v4823_v29  ;;  %v1526_v53 = vand.u32 4294901760, %v1525_v47 }
 0x18e   :  { %3496 = vmatprep.subr.mxu0 %v3944_v0  ;;  %3532 = vmatpush3.msra.mxu1 %v1463_v13  ;;  %v4838_v15 = vsub.f32 %v1347_v17, %v4827_v34  ;;  %v1546_v58 = vsub.f32 %v4845_v26, %v5419_v3 }
 0x18f   :  { %3497 = vmatpush3.msra.mxu0 %v4700_v27  ;;  %3533 = vmatprep.subr.mxu1 %v3944_v0  ;;  %v1532_v13 = vsub.f32 %v4823_v29, %v1531_v52 }
 0x190   :  { %3498 = vmatprep.subr.mxu0 %v3944_v0  ;;  %3534 = vmatpush3.msra.mxu1 %v1470_v49  ;;  %v4847_v49 = vand.u32 4294901760, %v1345_v48  ;;  %v1547_v56 = vand.u32 4294901760, %v1546_v58 }
 0x191   :  { %3499 = vmatpush3.msra.mxu0 %v4703_v35  ;;  %3535 = vmatprep.subr.mxu1 %v3944_v0 }
 0x192   :  { %3500 = vmatprep.subr.mxu0 %v3944_v0  ;;  %3536 = vmatpush3.msra.mxu1 %v1477_v54  ;;  %v5420_v54 = vand.u32 4294901760, %v4838_v15  ;;  %v4855_v8 = vsub.f32 %v1345_v48, %v4847_v49 }
 0x193   :  { %3501 = vmatpush3.msra.mxu0 %v4705_v40  ;;  %3537 = vmatprep.subr.mxu1 %v3944_v0 }
 0x194   :  { %3502 = vmatprep.subr.mxu0 %v3944_v0  ;;  %3538 = vmatpush3.msra.mxu1 %v1484_v55  ;;  %v1533_v55 = vand.u32 4294901760, %v1532_v13  ;;  %v1539_v38 = vsub.f32 %v4838_v15, %v5420_v54 }
 0x195   :  { %3503 = vmatpush3.msra.mxu0 %v4707_v43  ;;  %3539 = vmatprep.subr.mxu1 %v3944_v0 }
 0x196   :  { %3504 = vmatprep.subr.mxu0 %v3944_v0  ;;  %3540 = vmatpush3.msra.mxu1 %v1491_v37  ;;  %v4857_v37 = vand.u32 4294901760, %v1344_v1 }
 0x197   :  { %3505 = vmatpush3.msra.mxu0 %v4715_v61  ;;  %3541 = vmatprep.subr.mxu1 %v3944_v0 }
 0x198   :  { %3506 = vmatprep.subr.mxu0 %v3944_v0  ;;  %3542 = vmatpush3.msra.mxu1 %v1498_v7  ;;  %v5418_v7 = vand.u32 4294901760, %v4855_v8  ;;  %v4870_v6 = vsub.f32 %v1344_v1, %v4857_v37 }
 0x199   :  { %3507 = vmatpush3.msra.mxu0 %v4717_v62  ;;  %3543 = vmatprep.subr.mxu1 %v3944_v0 }
 0x19a   :  { %3508 = vmatprep.subr.mxu0 %v3944_v0  ;;  %3544 = vmatpush3.msra.mxu1 %v1505_v4  ;;  %v1540_v4 = vand.u32 4294901760, %v1539_v38  ;;  %v1553_v60 = vsub.f32 %v4855_v8, %v5418_v7  ;;  %v5417_v17 = vand.u32 4294901760, %v4870_v6 }
 0x19b   :  { %3509 = vmatpush3.msra.mxu0 %v4729_v42  ;;  %3545 = vmatprep.subr.mxu1 %v3944_v0 }
 0x19c   :  { %3510 = vmatprep.subr.mxu0 %v3944_v0  ;;  %3546 = vmatpush3.msra.mxu1 %v1512_v18  ;;  %v1554_v18 = vand.u32 4294901760, %v1553_v60  ;;  %v1560_v21 = vsub.f32 %v4870_v6, %v5417_v17 }
 0x19d   :  { %3511 = vmatpush3.msra.mxu0 %v4784_v44  ;;  %3547 = vmatprep.subr.mxu1 %v3944_v0 }
 0x19e   :  { %3512 = vmatprep.subr.mxu0 %v3944_v0  ;;  %3548 = vmatpush3.msra.mxu1 %v1519_v46  ;;  %v1561_v45 = vand.u32 4294901760, %v1560_v21 }
 0x19f   :  { %3513 = vmatpush3.msra.mxu0 %v4792_v39  ;;  %3549 = vmatprep.subr.mxu1 %v3944_v0 }
 0x1a0   :  { %3514 = vmatprep.subr.mxu0 %v3944_v0  ;;  %3550 = vmatpush3.msra.mxu1 %v1526_v53 }
 0x1a1   :  { %3515 = vmatpush3.msra.mxu0 %v4801_v23  ;;  %3551 = vmatprep.subr.mxu1 %v3944_v0 }
 0x1a2   :  { %3516 = vmatprep.subr.mxu0 %v3944_v0  ;;  %3552 = vmatpush3.msra.mxu1 %v1533_v55 }
 0x1a3   :  { %3517 = vmatpush3.msra.mxu0 %v4813_v11  ;;  %3553 = vmatprep.subr.mxu1 %v3944_v0 }
 0x1a4   :  { %3518 = vmatprep.subr.mxu0 %v3944_v0  ;;  %3554 = vmatpush3.msra.mxu1 %v1540_v4 }
 0x1a5   :  { %3519 = vmatpush3.msra.mxu0 %v4827_v34  ;;  %3555 = vmatprep.subr.mxu1 %v3944_v0 }
 0x1a6   :  { %3520 = vmatprep.subr.mxu0 %v3944_v0  ;;  %3556 = vmatpush3.msra.mxu1 %v1547_v56 }
 0x1a7   :  { %3521 = vmatpush3.msra.mxu0 %v4834_v12  ;;  %3557 = vmatprep.subr.mxu1 %v3944_v0 }
 0x1a8   :  { %3522 = vmatprep.subr.mxu0 %v3944_v0  ;;  %3558 = vmatpush3.msra.mxu1 %v1554_v18 }
 0x1a9   :  { %3523 = vmatpush3.msra.mxu0 %v4847_v49  ;;  %3559 = vmatprep.subr.mxu1 %v3944_v0 }
 0x1aa   :  { %3524 = vmatprep.subr.mxu0 %v3944_v0  ;;  %3560 = vmatpush3.msra.mxu1 %v1561_v45 }
 0x1ab   :  { %3525 = vmatpush3.msra.mxu0 %v4857_v37  ;;  %3599 = vmatprep.subr.mxu1 %v3944_v0 }
 0x1ac   :  { %3564 = vmatprep.subr.mxu0 %v3944_v0 }
 0x202   :  { %v939_v46 = vpop.f32.mrf.mxu1 }
 0x204   :  { %v3353_v47 = vpop.f32.mrf.mxu1 }
 0x20a   :  { %v788_v48 = vpop.f32.mrf.mxu0 }
 0x20b   :  { %v940_v4 = vadd.f32 %v939_v46, %v788_v48 }
 0x20c   :  { %v3318_v53 = vpop.f32.mrf.mxu0 }
 0x222   :  { %v1132_v13 = vpop.f32.mrf.mxu1 }
 0x224   :  { %v3423_v1 = vpop.f32.mrf.mxu1 }
 0x22b   :  { %v1043_v55 = vpop.f32.mrf.mxu0 }
 0x22c   :  { %v1044_v60 = vadd.f32 %v1043_v55, %v940_v4 }
 0x22d   :  { %v3388_v38 = vpop.f32.mrf.mxu0 }
 0x22e   :  { %v1133_v17 = vadd.f32 %v1132_v13, %v1044_v60  ;;  %v2010_v13 = vld [vmem:[#allocation2 + $0x1b8] sm:$0xff] }
 0x22f   :  { %v5143_v38 = vand.u32 4294901760, %v2010_v13 }
 0x244   :  { %v1338_v58 = vpop.f32.mrf.mxu1 }
 0x246   :  { %v3493_v56 = vpop.f32.mrf.mxu1 }
 0x247   :  { %v5149_v56 = vsub.f32 %v2010_v13, %v5143_v38 }
 0x24c   :  { %v1251_v21 = vpop.f32.mrf.mxu0 }
 0x24d   :  { %v1252_v18 = vadd.f32 %v1251_v21, %v1133_v17  ;;  %v2008_v21 = vld [vmem:[#allocation2 + $0x1a8] sm:$0xff] }
 0x24e   :  { %v3458_v7 = vpop.f32.mrf.mxu0 }
 0x24f   :  { %v1339_v3 = vadd.f32 %v1338_v58, %v1252_v18  ;;  %v2009_v58 = vld [vmem:[#allocation2 + $0x1b0] sm:$0xff] }
 0x250   :  { %v5151_v60 = vand.u32 4294901760, %v2009_v58 }
 0x251   :  { %v1342_v45 = vmax.f32 %v1339_v3, 0.0 }
 0x253   :  { %v4887_v54 = vand.u32 4294901760, %v1342_v45 }
 0x255   :  { %v4890_v47 = vsub.f32 %v1342_v45, %v4887_v54  ;;  %3562 = vmatmul.mubr.f32.vlgmr.msra.gmra.mxu1 %v4887_v54  ;;  %v2169_v45 = vand.u32 4294901760, %v5149_v56 }
 0x256   :  { %3600 = vmatpush3.msra.mxu1 %v4695_v20  ;;  %3631 = vmatprep.mubr.msk.f32.mxu1 %vm3945_vm0, %v3944_v0 }
 0x257   :  { %v1443_v46 = vand.u32 4294901760, %v4890_v47  ;;  %3601 = vmatprep.subr.mxu1 %v3944_v0 }
 0x258   :  { %3602 = vmatpush3.msra.mxu1 %v4700_v27 }
 0x259   :  { %3603 = vmatprep.subr.mxu1 %v3944_v0  ;;  %v1444_v3 = vsub.f32 %v4890_v47, %v1443_v46 }
 0x25a   :  { %3604 = vmatpush3.msra.mxu1 %v4703_v35 }
 0x25b   :  { %3605 = vmatprep.subr.mxu1 %v3944_v0  ;;  %v1445_v7 = vand.u32 4294901760, %v1444_v3  ;;  %v2007_v3 = vld [vmem:[#allocation2 + $0x1a0] sm:$0xff] }
 0x25c   :  { %3606 = vmatpush3.msra.mxu1 %v4705_v40 }
 0x25d   :  { %3607 = vmatprep.subr.mxu1 %v3944_v0  ;;  %3527 = vmatmul.mubr.f32.vlgmr.msra.gmra.mxu0 %v1445_v7  ;;  %v2170_v7 = vsub.f32 %v5149_v56, %v2169_v45 }
 0x25e   :  { %3565 = vmatpush3.msra.mxu0 %v4698_v25  ;;  %3608 = vmatpush3.msra.mxu1 %v4707_v43  ;;  %v5430_v25 = vand.u32 4294901760, %v4845_v26 }
 0x25f   :  { %3566 = vmatprep.subr.mxu0 %v3944_v0  ;;  %3609 = vmatprep.subr.mxu1 %v3944_v0 }
 0x260   :  { %3567 = vmatpush3.msra.mxu0 %v4712_v59  ;;  %3610 = vmatpush3.msra.mxu1 %v4715_v61 }
 0x261   :  { %3568 = vmatprep.subr.mxu0 %v3944_v0  ;;  %3611 = vmatprep.subr.mxu1 %v3944_v0 }
 0x262   :  { %3569 = vmatpush3.msra.mxu0 %v4720_v63  ;;  %3612 = vmatpush3.msra.mxu1 %v4717_v62  ;;  %v2015_v63 = vld [vmem:[#allocation2 + $0x1e0] sm:$0xff] }
 0x263   :  { %3570 = vmatprep.subr.mxu0 %v3944_v0  ;;  %3613 = vmatprep.subr.mxu1 %v3944_v0 }
 0x264   :  { %3571 = vmatpush3.msra.mxu0 %v4723_v19  ;;  %3614 = vmatpush3.msra.mxu1 %v4729_v42  ;;  %v2014_v19 = vld [vmem:[#allocation2 + $0x1d8] sm:$0xff] }
 0x265   :  { %3572 = vmatprep.subr.mxu0 %v3944_v0  ;;  %3615 = vmatprep.subr.mxu1 %v3944_v0 }
 0x266   :  { %3573 = vmatpush3.msra.mxu0 %v4726_v31  ;;  %3616 = vmatpush3.msra.mxu1 %v4784_v44 }
 0x267   :  { %3574 = vmatprep.subr.mxu0 %v3944_v0  ;;  %3617 = vmatprep.subr.mxu1 %v3944_v0 }
 0x268   :  { %3575 = vmatpush3.msra.mxu0 %v4736_v14  ;;  %3618 = vmatpush3.msra.mxu1 %v4792_v39  ;;  %v2013_v14 = vld [vmem:[#allocation2 + $0x1d0] sm:$0xff] }
 0x269   :  { %3576 = vmatprep.subr.mxu0 %v3944_v0  ;;  %3619 = vmatprep.subr.mxu1 %v3944_v0 }
 0x26a   :  { %3577 = vmatpush3.msra.mxu0 %v4740_v33  ;;  %3620 = vmatpush3.msra.mxu1 %v4801_v23  ;;  %v2012_v33 = vld [vmem:[#allocation2 + $0x1c8] sm:$0xff] }
 0x26b   :  { %3578 = vmatprep.subr.mxu0 %v3944_v0  ;;  %3621 = vmatprep.subr.mxu1 %v3944_v0 }
 0x26c   :  { %3579 = vmatpush3.msra.mxu0 %v4752_v30  ;;  %3622 = vmatpush3.msra.mxu1 %v4813_v11  ;;  %v5076_v30 = vand.u32 4294901760, %v2012_v33 }
 0x26d   :  { %3580 = vmatprep.subr.mxu0 %v3944_v0  ;;  %3623 = vmatprep.subr.mxu1 %v3944_v0 }
 0x26e   :  { %3581 = vmatpush3.msra.mxu0 %v4790_v9  ;;  %3624 = vmatpush3.msra.mxu1 %v4827_v34 }
 0x26f   :  { %3582 = vmatprep.subr.mxu0 %v3944_v0  ;;  %3625 = vmatprep.subr.mxu1 %v3944_v0 }
 0x270   :  { %3583 = vmatpush3.msra.mxu0 %v4799_v24  ;;  %3626 = vmatpush3.msra.mxu1 %v4834_v12 }
 0x271   :  { %3584 = vmatprep.subr.mxu0 %v3944_v0  ;;  %3627 = vmatprep.subr.mxu1 %v3944_v0 }
 0x272   :  { %3585 = vmatpush3.msra.mxu0 %v4811_v10  ;;  %3628 = vmatpush3.msra.mxu1 %v4847_v49 }
 0x273   :  { %3586 = vmatprep.subr.mxu0 %v3944_v0  ;;  %3629 = vmatprep.subr.mxu1 %v3944_v0 }
 0x274   :  { %3587 = vmatpush3.msra.mxu0 %v4823_v29  ;;  %3630 = vmatpush3.msra.mxu1 %v4857_v37 }
 0x275   :  { %3588 = vmatprep.subr.mxu0 %v3944_v0  ;;  %3632 = vmatmul.mubr.f32.vlgmr.msra.gmra.mxu1 %v1443_v46  ;;  %v5160_v46 = vand.u32 4294901760, %v2008_v21 }
 0x276   :  { %3669 = vmatprep.subr.mxu1 %v3944_v0  ;;  %3589 = vmatpush3.msra.mxu0 %v4838_v15 }
 0x277   :  { %3670 = vmatpush3.msra.mxu1 %v4695_v20  ;;  %3590 = vmatprep.subr.mxu0 %v3944_v0  ;;  %v5429_v20 = vand.u32 4294901760, %v4838_v15 }
 0x278   :  { %3671 = vmatprep.subr.mxu1 %v3944_v0  ;;  %3591 = vmatpush3.msra.mxu0 %v4845_v26 }
 0x279   :  { %3672 = vmatpush3.msra.mxu1 %v4700_v27  ;;  %3592 = vmatprep.subr.mxu0 %v3944_v0  ;;  %v5431_v27 = vand.u32 4294901760, %v4855_v8 }
 0x27a   :  { %3673 = vmatprep.subr.mxu1 %v3944_v0  ;;  %3593 = vmatpush3.msra.mxu0 %v4855_v8 }
 0x27b   :  { %3674 = vmatpush3.msra.mxu1 %v4703_v35  ;;  %3594 = vmatprep.subr.mxu0 %v3944_v0  ;;  %v5432_v35 = vand.u32 4294901760, %v4870_v6 }
 0x27c   :  { %3675 = vmatprep.subr.mxu1 %v3944_v0  ;;  %3595 = vmatpush3.msra.mxu0 %v4870_v6 }
 0x27d   :  { %3596 = vmatprep.mubr.msk.f32.mxu0 %vm3945_vm0, %v3944_v0  ;;  %3676 = vmatpush3.msra.mxu1 %v4705_v40  ;;  %v2018_v40 = vld [vmem:[#allocation2 + $0x1f8] sm:$0xff] }
 0x27e   :  { %3597 = vmatmul.mubr.f32.vlgmr.msra.gmra.mxu0 %v4890_v47  ;;  %3634 = vmatprep.subr.mxu0 %v3944_v0  ;;  %v5158_v47 = vsub.f32 %v2009_v58, %v5151_v60 }
 0x27f   :  { %3677 = vmatprep.subr.mxu1 %v3944_v0  ;;  %3635 = vmatpush3.msra.mxu0 %v1454_v57  ;;  %v2017_v57 = vld [vmem:[#allocation2 + $0x1f0] sm:$0xff] }
 0x280   :  { %3678 = vmatpush3.msra.mxu1 %v4707_v43  ;;  %3636 = vmatprep.subr.mxu0 %v3944_v0  ;;  %v5054_v43 = vand.u32 4294901760, %v2018_v40 }
 0x281   :  { %3679 = vmatprep.subr.mxu1 %v3944_v0  ;;  %3637 = vmatpush3.msra.mxu0 %v1461_v2  ;;  %v5066_v2 = vand.u32 4294901760, %v2014_v19 }
 0x282   :  { %3680 = vmatpush3.msra.mxu1 %v4715_v61  ;;  %3638 = vmatprep.subr.mxu0 %v3944_v0  ;;  %v5057_v59 = vsub.f32 %v2018_v40, %v5054_v43  ;;  %v5059_v61 = vand.u32 4294901760, %v2017_v57  ;;  %v2171_v40 = vand.u32 4294901760, %v2170_v7 }
 0x283   :  { %3681 = vmatprep.subr.mxu1 %v3944_v0  ;;  %3639 = vmatpush3.msra.mxu0 %v1468_v41  ;;  %v2011_v41 = vld [vmem:[#allocation2 + $0x1c0] sm:$0xff] }
 0x284   :  { %3682 = vmatpush3.msra.mxu1 %v4717_v62  ;;  %3640 = vmatprep.subr.mxu0 %v3944_v0  ;;  %v2016_v62 = vld [vmem:[#allocation2 + $0x1e8] sm:$0xff]  ;;  %v5088_v9 = vand.u32 4294901760, %v2011_v41 }
 0x285   :  { %3683 = vmatprep.subr.mxu1 %v3944_v0  ;;  %3641 = vmatpush3.msra.mxu0 %v1475_v50  ;;  %v5062_v31 = vand.u32 4294901760, %v2016_v62  ;;  %v2113_v50 = vand.u32 4294901760, %v5057_v59 }
 0x286   :  { %3684 = vmatpush3.msra.mxu1 %v4729_v42  ;;  %3642 = vmatprep.subr.mxu0 %v3944_v0  ;;  %v5064_v42 = vand.u32 4294901760, %v2015_v63 }
 0x287   :  { %3685 = vmatprep.subr.mxu1 %v3944_v0  ;;  %3643 = vmatpush3.msra.mxu0 %v1482_v51  ;;  %v5071_v51 = vsub.f32 %v2017_v57, %v5059_v61 }
 0x288   :  { %3686 = vmatpush3.msra.mxu1 %v4784_v44  ;;  %3644 = vmatprep.subr.mxu0 %v3944_v0  ;;  %v5085_v44 = vsub.f32 %v2014_v19, %v5066_v2 }
 0x289   :  { %3687 = vmatprep.subr.mxu1 %v3944_v0  ;;  %3645 = vmatpush3.msra.mxu0 %v1489_v16  ;;  %v5074_v16 = vand.u32 4294901760, %v2013_v14 }
 0x28a   :  { %3688 = vmatpush3.msra.mxu1 %v4792_v39  ;;  %3646 = vmatprep.subr.mxu0 %v3944_v0  ;;  %v2114_v39 = vsub.f32 %v5057_v59, %v2113_v50 }
 0x28b   :  { %3689 = vmatprep.subr.mxu1 %v3944_v0  ;;  %3647 = vmatpush3.msra.mxu0 %v1496_v32  ;;  %v5079_v32 = vsub.f32 %v2016_v62, %v5062_v31  ;;  %v5095_v24 = vsub.f32 %v2013_v14, %v5074_v16  ;;  %v2005_v14 = vld [vmem:[#allocation2 + $0x190] sm:$0xff] }
 0x28c   :  { %3690 = vmatpush3.msra.mxu1 %v4801_v23  ;;  %3648 = vmatprep.subr.mxu0 %v3944_v0  ;;  %v5099_v23 = vsub.f32 %v2012_v33, %v5076_v30 }
 0x28d   :  { %3691 = vmatprep.subr.mxu1 %v3944_v0  ;;  %3649 = vmatpush3.msra.mxu0 %v1503_v36  ;;  %v5082_v36 = vsub.f32 %v2015_v63, %v5064_v42 }
 0x28e   :  { %3692 = vmatpush3.msra.mxu1 %v4813_v11  ;;  %3650 = vmatprep.subr.mxu0 %v3944_v0  ;;  %v2141_v11 = vand.u32 4294901760, %v5085_v44 }
 0x28f   :  { %3693 = vmatprep.subr.mxu1 %v3944_v0  ;;  %3651 = vmatpush3.msra.mxu0 %v1510_v22  ;;  %v2120_v22 = vand.u32 4294901760, %v5071_v51  ;;  %v2134_v10 = vand.u32 4294901760, %v5082_v36 }
 0x290   :  { %3694 = vmatpush3.msra.mxu1 %v4827_v34  ;;  %3652 = vmatprep.subr.mxu0 %v3944_v0  ;;  %v2148_v34 = vand.u32 4294901760, %v5095_v24 }
 0x291   :  { %3695 = vmatprep.subr.mxu1 %v3944_v0  ;;  %3653 = vmatpush3.msra.mxu0 %v1517_v5  ;;  %v2127_v5 = vand.u32 4294901760, %v5079_v32  ;;  %v2121_v29 = vsub.f32 %v5071_v51, %v2120_v22  ;;  %v2135_v15 = vsub.f32 %v5082_v36, %v2134_v10 }
 0x292   :  { %3696 = vmatpush3.msra.mxu1 %v4834_v12  ;;  %3654 = vmatprep.subr.mxu0 %v3944_v0  ;;  %v2149_v6 = vsub.f32 %v5095_v24, %v2148_v34 }
 0x293   :  { %3697 = vmatprep.subr.mxu1 %v3944_v0  ;;  %3655 = vmatpush3.msra.mxu0 %v1524_v28  ;;  %v2115_v28 = vand.u32 4294901760, %v2114_v39  ;;  %v2128_v12 = vsub.f32 %v5079_v32, %v2127_v5  ;;  %v2122_v26 = vand.u32 4294901760, %v2121_v29 }
 0x294   :  { %3698 = vmatpush3.msra.mxu1 %v4847_v49  ;;  %3656 = vmatprep.subr.mxu0 %v3944_v0  ;;  %v2142_v49 = vsub.f32 %v5085_v44, %v2141_v11  ;;  %v2150_v1 = vand.u32 4294901760, %v2149_v6  ;;  %v2003_v6 = vld [vmem:[#allocation2 + $0x180] sm:$0xff] }
 0x295   :  { %3699 = vmatprep.subr.mxu1 %v3944_v0  ;;  %3657 = vmatpush3.msra.mxu0 %v1531_v52  ;;  %v5111_v52 = vsub.f32 %v2011_v41, %v5088_v9  ;;  %v2129_v8 = vand.u32 4294901760, %v2128_v12  ;;  %v2004_v12 = vld [vmem:[#allocation2 + $0x188] sm:$0xff] }
 0x296   :  { %3700 = vmatpush3.msra.mxu1 %v4857_v37  ;;  %3701 = vmatprep.mubr.msk.f32.mxu1 %vm3945_vm0, %v3944_v0  ;;  %v2136_v37 = vand.u32 4294901760, %v2135_v15  ;;  %v2143_v48 = vand.u32 4294901760, %v2142_v49 }
 0x297   :  { %3658 = vmatprep.subr.mxu0 %v3944_v0  ;;  %3702 = vmatmul.mubr.f32.vlgmr.msra.gmra.mxu1 %v4887_v54  ;;  %v2162_v17 = vand.u32 4294901760, %v5111_v52 }
 0x298   :  { %3659 = vmatpush3.msra.mxu0 %v5429_v20  ;;  %3666 = vmatprep.mubr.msk.f32.mxu0 %vm3945_vm0, %v3944_v0  ;;  %v2176_v20 = vand.u32 4294901760, %v5158_v47 }
 0x299   :  { %3660 = vmatprep.subr.mxu0 %v3944_v0  ;;  %3739 = vmatprep.subr.mxu1 %v3944_v0  ;;  %v2163_v55 = vsub.f32 %v5111_v52, %v2162_v17 }
 0x29a   :  { %3661 = vmatpush3.msra.mxu0 %v5430_v25  ;;  %3771 = vmatprep.mubr.msk.f32.mxu1 %vm3945_vm0, %v3944_v0  ;;  %v5170_v25 = vsub.f32 %v2008_v21, %v5160_v46  ;;  %v2177_v57 = vsub.f32 %v5158_v47, %v2176_v20 }
 0x29b   :  { %3662 = vmatprep.subr.mxu0 %v3944_v0  ;;  %3740 = vmatpush3.msra.mxu1 %v2115_v28  ;;  %v2164_v18 = vand.u32 4294901760, %v2163_v55  ;;  %v5193_v28 = vand.u32 4294901760, %v2005_v14 }
 0x29c   :  { %3663 = vmatpush3.msra.mxu0 %v5431_v27  ;;  %3741 = vmatprep.subr.mxu1 %v3944_v0  ;;  %v5172_v27 = vand.u32 4294901760, %v2007_v3  ;;  %v2183_v62 = vand.u32 4294901760, %v5170_v25  ;;  %v2178_v33 = vand.u32 4294901760, %v2177_v57 }
 0x29d   :  { %3664 = vmatprep.subr.mxu0 %v3944_v0  ;;  %3742 = vmatpush3.msra.mxu1 %v2122_v26  ;;  %v5204_v49 = vsub.f32 %v2005_v14, %v5193_v28 }
 0x29e   :  { %3665 = vmatpush3.msra.mxu0 %v5432_v35  ;;  %3743 = vmatprep.subr.mxu1 %v3944_v0  ;;  %v2006_v35 = vld [vmem:[#allocation2 + $0x198] sm:$0xff]  ;;  %v5182_v63 = vsub.f32 %v2007_v3, %v5172_v27  ;;  %v2184_v41 = vsub.f32 %v5170_v25, %v2183_v62 }
 0x29f   :  { %3667 = vmatmul.mubr.f32.vlgmr.msra.gmra.mxu0 %v4887_v54  ;;  %3704 = vmatprep.subr.mxu0 %v3944_v0  ;;  %v2155_v54 = vand.u32 4294901760, %v5099_v23  ;;  %v5186_v19 = vand.u32 4294901760, %v2006_v35 }
 0x2a0   :  { %3736 = vmatprep.mubr.msk.f32.mxu0 %vm3945_vm0, %v3944_v0  ;;  %3705 = vmatpush3.msra.mxu0 %v5054_v43  ;;  %v2190_v39 = vand.u32 4294901760, %v5182_v63  ;;  %v2185_v15 = vand.u32 4294901760, %v2184_v41 }
 0x2a1   :  { %3706 = vmatprep.subr.mxu0 %v3944_v0  ;;  %3744 = vmatpush3.msra.mxu1 %v2129_v8  ;;  %v2156_v53 = vsub.f32 %v5099_v23, %v2155_v54  ;;  %v5197_v29 = vsub.f32 %v2006_v35, %v5186_v19  ;;  %v5206_v8 = vand.u32 4294901760, %v2004_v12 }
 0x2a2   :  { %3707 = vmatpush3.msra.mxu0 %v5059_v61  ;;  %3745 = vmatprep.subr.mxu1 %v3944_v0  ;;  %v2191_v26 = vsub.f32 %v5182_v63, %v2190_v39 }
 0x2a3   :  { %3708 = vmatprep.subr.mxu0 %v3944_v0  ;;  %3746 = vmatpush3.msra.mxu1 %v2136_v37  ;;  %v2157_v4 = vand.u32 4294901760, %v2156_v53  ;;  %v5424_v37 = vand.u32 4294901760, %v5197_v29  ;;  %v5423_v53 = vand.u32 4294901760, %v5204_v49  ;;  %v5214_v13 = vsub.f32 %v2004_v12, %v5206_v8 }
 0x2a4   :  { %3709 = vmatpush3.msra.mxu0 %v5062_v31  ;;  %3747 = vmatprep.subr.mxu1 %v3944_v0 }
 0x2a5   :  { %3710 = vmatprep.subr.mxu0 %v3944_v0  ;;  %3748 = vmatpush3.msra.mxu1 %v2143_v48  ;;  %v2192_v48 = vand.u32 4294901760, %v2191_v26  ;;  %v2198_v55 = vsub.f32 %v5197_v29, %v5424_v37  ;;  %v2205_v58 = vsub.f32 %v5204_v49, %v5423_v53 }
 0x2a6   :  { %3711 = vmatpush3.msra.mxu0 %v5064_v42  ;;  %3749 = vmatprep.subr.mxu1 %v3944_v0 }
 0x2a7   :  { %3712 = vmatprep.subr.mxu0 %v3944_v0  ;;  %3750 = vmatpush3.msra.mxu1 %v2150_v1  ;;  %v5216_v1 = vand.u32 4294901760, %v2003_v6  ;;  %v2206_v3 = vand.u32 4294901760, %v2205_v58 }
 0x2a8   :  { %3713 = vmatpush3.msra.mxu0 %v5066_v2  ;;  %3751 = vmatprep.subr.mxu1 %v3944_v0 }
 0x2a9   :  { %3714 = vmatprep.subr.mxu0 %v3944_v0  ;;  %3752 = vmatpush3.msra.mxu1 %v2157_v4  ;;  %v5422_v4 = vand.u32 4294901760, %v5214_v13  ;;  %v5229_v21 = vsub.f32 %v2003_v6, %v5216_v1 }
 0x2aa   :  { %3715 = vmatpush3.msra.mxu0 %v5074_v16  ;;  %3753 = vmatprep.subr.mxu1 %v3944_v0 }
 0x2ab   :  { %3716 = vmatprep.subr.mxu0 %v3944_v0  ;;  %3754 = vmatpush3.msra.mxu1 %v2164_v18  ;;  %v2199_v18 = vand.u32 4294901760, %v2198_v55  ;;  %v2212_v7 = vsub.f32 %v5214_v13, %v5422_v4  ;;  %v5421_v35 = vand.u32 4294901760, %v5229_v21 }
 0x2ac   :  { %3717 = vmatpush3.msra.mxu0 %v5076_v30  ;;  %3755 = vmatprep.subr.mxu1 %v3944_v0 }
 0x2ad   :  { %3718 = vmatprep.subr.mxu0 %v3944_v0  ;;  %3756 = vmatpush3.msra.mxu1 %v2171_v40  ;;  %v2213_v40 = vand.u32 4294901760, %v2212_v7  ;;  %v2219_v57 = vsub.f32 %v5229_v21, %v5421_v35 }
 0x2ae   :  { %3719 = vmatpush3.msra.mxu0 %v5088_v9  ;;  %3757 = vmatprep.subr.mxu1 %v3944_v0 }
 0x2af   :  { %3720 = vmatprep.subr.mxu0 %v3944_v0  ;;  %3758 = vmatpush3.msra.mxu1 %v2178_v33  ;;  %v2220_v14 = vand.u32 4294901760, %v2219_v57 }
 0x2b0   :  { %3721 = vmatpush3.msra.mxu0 %v5143_v38  ;;  %3759 = vmatprep.subr.mxu1 %v3944_v0 }
 0x2b1   :  { %3722 = vmatprep.subr.mxu0 %v3944_v0  ;;  %3760 = vmatpush3.msra.mxu1 %v2185_v15 }
 0x2b2   :  { %3723 = vmatpush3.msra.mxu0 %v5151_v60  ;;  %3761 = vmatprep.subr.mxu1 %v3944_v0 }
 0x2b3   :  { %3724 = vmatprep.subr.mxu0 %v3944_v0  ;;  %3762 = vmatpush3.msra.mxu1 %v2192_v48 }
 0x2b4   :  { %3725 = vmatpush3.msra.mxu0 %v5160_v46  ;;  %3763 = vmatprep.subr.mxu1 %v3944_v0 }
 0x2b5   :  { %3726 = vmatprep.subr.mxu0 %v3944_v0  ;;  %3764 = vmatpush3.msra.mxu1 %v2199_v18 }
 0x2b6   :  { %3727 = vmatpush3.msra.mxu0 %v5172_v27  ;;  %3765 = vmatprep.subr.mxu1 %v3944_v0 }
 0x2b7   :  { %3728 = vmatprep.subr.mxu0 %v3944_v0  ;;  %3766 = vmatpush3.msra.mxu1 %v2206_v3 }
 0x2b8   :  { %3729 = vmatpush3.msra.mxu0 %v5186_v19  ;;  %3767 = vmatprep.subr.mxu1 %v3944_v0 }
 0x2b9   :  { %3730 = vmatprep.subr.mxu0 %v3944_v0  ;;  %3768 = vmatpush3.msra.mxu1 %v2213_v40 }
 0x2ba   :  { %3731 = vmatpush3.msra.mxu0 %v5193_v28  ;;  %3769 = vmatprep.subr.mxu1 %v3944_v0 }
 0x2bb   :  { %3732 = vmatprep.subr.mxu0 %v3944_v0  ;;  %3770 = vmatpush3.msra.mxu1 %v2220_v14 }
 0x2bc   :  { %3733 = vmatpush3.msra.mxu0 %v5206_v8  ;;  %3809 = vmatprep.subr.mxu1 %v3944_v0 }
 0x2bd   :  { %3734 = vmatprep.subr.mxu0 %v3944_v0 }
 0x2be   :  { %3735 = vmatpush3.msra.mxu0 %v5216_v1 }
 0x2bf   :  { %3774 = vmatprep.subr.mxu0 %v3944_v0 }
 0x315   :  { %v1598_v33 = vpop.f32.mrf.mxu1 }
 0x317   :  { %v3563_v41 = vpop.f32.mrf.mxu1 }
 0x31d   :  { %v1447_v12 = vpop.f32.mrf.mxu0 }
 0x31e   :  { %v1599_v18 = vadd.f32 %v1598_v33, %v1447_v12 }
 0x31f   :  { %v3528_v15 = vpop.f32.mrf.mxu0 }
 0x335   :  { %v1791_v26 = vpop.f32.mrf.mxu1 }
 0x337   :  { %v3633_v6 = vpop.f32.mrf.mxu1 }
 0x33e   :  { %v1702_v48 = vpop.f32.mrf.mxu0 }
 0x33f   :  { %v1703_v7 = vadd.f32 %v1702_v48, %v1599_v18 }
 0x340   :  { %v3598_v55 = vpop.f32.mrf.mxu0 }
 0x341   :  { %v1792_v35 = vadd.f32 %v1791_v26, %v1703_v7 }
 0x357   :  { %v1997_v58 = vpop.f32.mrf.mxu1 }
 0x359   :  { %v3703_v3 = vpop.f32.mrf.mxu1 }
 0x35f   :  { %v1910_v57 = vpop.f32.mrf.mxu0 }
 0x360   :  { %v1911_v40 = vadd.f32 %v1910_v57, %v1792_v35 }
 0x361   :  { %v3668_v4 = vpop.f32.mrf.mxu0 }
 0x362   :  { %v1998_v53 = vadd.f32 %v1997_v58, %v1911_v40 }
 0x364   :  { %v2001_v14 = vmax.f32 %v1998_v53, 0.0 }
 0x366   :  { %v5246_v37 = vand.u32 4294901760, %v2001_v14 }
 0x368   :  { %v5249_v41 = vsub.f32 %v2001_v14, %v5246_v37  ;;  %3772 = vmatmul.mubr.f32.vlgmr.msra.gmra.mxu1 %v5246_v37 }
 0x369   :  { %3810 = vmatpush3.msra.mxu1 %v5054_v43  ;;  %3841 = vmatprep.mubr.msk.f32.mxu1 %vm3945_vm0, %v3944_v0 }
 0x36a   :  { %v2102_v33 = vand.u32 4294901760, %v5249_v41  ;;  %3811 = vmatprep.subr.mxu1 %v3944_v0 }
 0x36b   :  { %3812 = vmatpush3.msra.mxu1 %v5059_v61 }
 0x36c   :  { %3813 = vmatprep.subr.mxu1 %v3944_v0  ;;  %v2103_v53 = vsub.f32 %v5249_v41, %v2102_v33 }
 0x36d   :  { %3814 = vmatpush3.msra.mxu1 %v5062_v31 }
 0x36e   :  { %3815 = vmatprep.subr.mxu1 %v3944_v0  ;;  %v2104_v4 = vand.u32 4294901760, %v2103_v53 }
 0x36f   :  { %3816 = vmatpush3.msra.mxu1 %v5064_v42 }
 0x370   :  { %3817 = vmatprep.subr.mxu1 %v3944_v0  ;;  %3737 = vmatmul.mubr.f32.vlgmr.msra.gmra.mxu0 %v2104_v4 }
 0x371   :  { %3775 = vmatpush3.msra.mxu0 %v5057_v59  ;;  %3818 = vmatpush3.msra.mxu1 %v5066_v2  ;;  %v5434_v59 = vand.u32 4294901760, %v5204_v49 }
 0x372   :  { %3776 = vmatprep.subr.mxu0 %v3944_v0  ;;  %3819 = vmatprep.subr.mxu1 %v3944_v0 }
 0x373   :  { %3777 = vmatpush3.msra.mxu0 %v5071_v51  ;;  %3820 = vmatpush3.msra.mxu1 %v5074_v16 }
 0x374   :  { %3778 = vmatprep.subr.mxu0 %v3944_v0  ;;  %3821 = vmatprep.subr.mxu1 %v3944_v0 }
 0x375   :  { %3779 = vmatpush3.msra.mxu0 %v5079_v32  ;;  %3822 = vmatpush3.msra.mxu1 %v5076_v30 }
 0x376   :  { %3780 = vmatprep.subr.mxu0 %v3944_v0  ;;  %3823 = vmatprep.subr.mxu1 %v3944_v0 }
 0x377   :  { %3781 = vmatpush3.msra.mxu0 %v5082_v36  ;;  %3824 = vmatpush3.msra.mxu1 %v5088_v9 }
 0x378   :  { %3782 = vmatprep.subr.mxu0 %v3944_v0  ;;  %3825 = vmatprep.subr.mxu1 %v3944_v0 }
 0x379   :  { %3783 = vmatpush3.msra.mxu0 %v5085_v44  ;;  %3826 = vmatpush3.msra.mxu1 %v5143_v38 }
 0x37a   :  { %3784 = vmatprep.subr.mxu0 %v3944_v0  ;;  %3827 = vmatprep.subr.mxu1 %v3944_v0 }
 0x37b   :  { %3785 = vmatpush3.msra.mxu0 %v5095_v24  ;;  %3828 = vmatpush3.msra.mxu1 %v5151_v60 }
 0x37c   :  { %3786 = vmatprep.subr.mxu0 %v3944_v0  ;;  %3829 = vmatprep.subr.mxu1 %v3944_v0 }
 0x37d   :  { %3787 = vmatpush3.msra.mxu0 %v5099_v23  ;;  %3830 = vmatpush3.msra.mxu1 %v5160_v46 }
 0x37e   :  { %3788 = vmatprep.subr.mxu0 %v3944_v0  ;;  %3831 = vmatprep.subr.mxu1 %v3944_v0 }
 0x37f   :  { %3789 = vmatpush3.msra.mxu0 %v5111_v52  ;;  %3832 = vmatpush3.msra.mxu1 %v5172_v27 }
 0x380   :  { %3790 = vmatprep.subr.mxu0 %v3944_v0  ;;  %3833 = vmatprep.subr.mxu1 %v3944_v0 }
 0x381   :  { %3791 = vmatpush3.msra.mxu0 %v5149_v56  ;;  %3834 = vmatpush3.msra.mxu1 %v5186_v19 }
 0x382   :  { %3792 = vmatprep.subr.mxu0 %v3944_v0  ;;  %3835 = vmatprep.subr.mxu1 %v3944_v0 }
 0x383   :  { %3793 = vmatpush3.msra.mxu0 %v5158_v47  ;;  %3836 = vmatpush3.msra.mxu1 %v5193_v28 }
 0x384   :  { %3794 = vmatprep.subr.mxu0 %v3944_v0  ;;  %3837 = vmatprep.subr.mxu1 %v3944_v0 }
 0x385   :  { %3795 = vmatpush3.msra.mxu0 %v5170_v25  ;;  %3838 = vmatpush3.msra.mxu1 %v5206_v8 }
 0x386   :  { %3796 = vmatprep.subr.mxu0 %v3944_v0  ;;  %3839 = vmatprep.subr.mxu1 %v3944_v0 }
 0x387   :  { %3797 = vmatpush3.msra.mxu0 %v5182_v63  ;;  %3840 = vmatpush3.msra.mxu1 %v5216_v1 }
 0x388   :  { %3798 = vmatprep.subr.mxu0 %v3944_v0  ;;  %3842 = vmatmul.mubr.f32.vlgmr.msra.gmra.mxu1 %v2102_v33 }
 0x389   :  { %3879 = vmatprep.subr.mxu1 %v3944_v0  ;;  %3799 = vmatpush3.msra.mxu0 %v5197_v29 }
 0x38a   :  { %3880 = vmatpush3.msra.mxu1 %v5054_v43  ;;  %3800 = vmatprep.subr.mxu0 %v3944_v0  ;;  %v5433_v43 = vand.u32 4294901760, %v5197_v29 }
 0x38b   :  { %3881 = vmatprep.subr.mxu1 %v3944_v0  ;;  %3801 = vmatpush3.msra.mxu0 %v5204_v49 }
 0x38c   :  { %3882 = vmatpush3.msra.mxu1 %v5059_v61  ;;  %3802 = vmatprep.subr.mxu0 %v3944_v0  ;;  %v5435_v61 = vand.u32 4294901760, %v5214_v13 }
 0x38d   :  { %3883 = vmatprep.subr.mxu1 %v3944_v0  ;;  %3803 = vmatpush3.msra.mxu0 %v5214_v13 }
 0x38e   :  { %3884 = vmatpush3.msra.mxu1 %v5062_v31  ;;  %3804 = vmatprep.subr.mxu0 %v3944_v0  ;;  %v5436_v31 = vand.u32 4294901760, %v5229_v21 }
 0x38f   :  { %3885 = vmatprep.subr.mxu1 %v3944_v0  ;;  %3805 = vmatpush3.msra.mxu0 %v5229_v21 }
 0x390   :  { %3806 = vmatprep.mubr.msk.f32.mxu0 %vm3945_vm0, %v3944_v0  ;;  %3886 = vmatpush3.msra.mxu1 %v5064_v42 }
 0x391   :  { %3807 = vmatmul.mubr.f32.vlgmr.msra.gmra.mxu0 %v5249_v41  ;;  %3844 = vmatprep.subr.mxu0 %v3944_v0 }
 0x392   :  { %3887 = vmatprep.subr.mxu1 %v3944_v0  ;;  %3845 = vmatpush3.msra.mxu0 %v2113_v50 }
 0x393   :  { %3888 = vmatpush3.msra.mxu1 %v5066_v2  ;;  %3846 = vmatprep.subr.mxu0 %v3944_v0 }
 0x394   :  { %3889 = vmatprep.subr.mxu1 %v3944_v0  ;;  %3847 = vmatpush3.msra.mxu0 %v2120_v22 }
 0x395   :  { %3890 = vmatpush3.msra.mxu1 %v5074_v16  ;;  %3848 = vmatprep.subr.mxu0 %v3944_v0 }
 0x396   :  { %3891 = vmatprep.subr.mxu1 %v3944_v0  ;;  %3849 = vmatpush3.msra.mxu0 %v2127_v5 }
 0x397   :  { %3892 = vmatpush3.msra.mxu1 %v5076_v30  ;;  %3850 = vmatprep.subr.mxu0 %v3944_v0 }
 0x398   :  { %3893 = vmatprep.subr.mxu1 %v3944_v0  ;;  %3851 = vmatpush3.msra.mxu0 %v2134_v10 }
 0x399   :  { %3894 = vmatpush3.msra.mxu1 %v5088_v9  ;;  %3852 = vmatprep.subr.mxu0 %v3944_v0 }
 0x39a   :  { %3895 = vmatprep.subr.mxu1 %v3944_v0  ;;  %3853 = vmatpush3.msra.mxu0 %v2141_v11 }
 0x39b   :  { %3896 = vmatpush3.msra.mxu1 %v5143_v38  ;;  %3854 = vmatprep.subr.mxu0 %v3944_v0 }
 0x39c   :  { %3897 = vmatprep.subr.mxu1 %v3944_v0  ;;  %3855 = vmatpush3.msra.mxu0 %v2148_v34 }
 0x39d   :  { %3898 = vmatpush3.msra.mxu1 %v5151_v60  ;;  %3856 = vmatprep.subr.mxu0 %v3944_v0 }
 0x39e   :  { %3899 = vmatprep.subr.mxu1 %v3944_v0  ;;  %3857 = vmatpush3.msra.mxu0 %v2155_v54 }
 0x39f   :  { %3900 = vmatpush3.msra.mxu1 %v5160_v46  ;;  %3858 = vmatprep.subr.mxu0 %v3944_v0 }
 0x3a0   :  { %3901 = vmatprep.subr.mxu1 %v3944_v0  ;;  %3859 = vmatpush3.msra.mxu0 %v2162_v17 }
 0x3a1   :  { %3902 = vmatpush3.msra.mxu1 %v5172_v27  ;;  %3860 = vmatprep.subr.mxu0 %v3944_v0 }
 0x3a2   :  { %3903 = vmatprep.subr.mxu1 %v3944_v0  ;;  %3861 = vmatpush3.msra.mxu0 %v2169_v45 }
 0x3a3   :  { %3904 = vmatpush3.msra.mxu1 %v5186_v19  ;;  %3862 = vmatprep.subr.mxu0 %v3944_v0 }
 0x3a4   :  { %3905 = vmatprep.subr.mxu1 %v3944_v0  ;;  %3863 = vmatpush3.msra.mxu0 %v2176_v20 }
 0x3a5   :  { %3906 = vmatpush3.msra.mxu1 %v5193_v28  ;;  %3864 = vmatprep.subr.mxu0 %v3944_v0 }
 0x3a6   :  { %3907 = vmatprep.subr.mxu1 %v3944_v0  ;;  %3865 = vmatpush3.msra.mxu0 %v2183_v62 }
 0x3a7   :  { %3908 = vmatpush3.msra.mxu1 %v5206_v8  ;;  %3866 = vmatprep.subr.mxu0 %v3944_v0 }
 0x3a8   :  { %3909 = vmatprep.subr.mxu1 %v3944_v0  ;;  %3867 = vmatpush3.msra.mxu0 %v2190_v39 }
 0x3a9   :  { %3910 = vmatpush3.msra.mxu1 %v5216_v1  ;;  %3911 = vmatprep.mubr.msk.f32.mxu1 %vm3945_vm0, %v3944_v0 }
 0x3aa   :  { %3868 = vmatprep.subr.mxu0 %v3944_v0  ;;  %3912 = vmatmul.mubr.f32.vlgmr.msra.gmra.mxu1 %v5246_v37 }
 0x3ab   :  { %3869 = vmatpush3.msra.mxu0 %v5433_v43  ;;  %3876 = vmatprep.mubr.msk.f32.mxu0 %vm3945_vm0, %v3944_v0 }
 0x3ac   :  { %3870 = vmatprep.subr.mxu0 %v3944_v0 }
 0x3ad   :  { %3871 = vmatpush3.msra.mxu0 %v5434_v59 }
 0x3ae   :  { %3872 = vmatprep.subr.mxu0 %v3944_v0 }
 0x3af   :  { %3873 = vmatpush3.msra.mxu0 %v5435_v61 }
 0x3b0   :  { %3874 = vmatprep.subr.mxu0 %v3944_v0 }
 0x3b1   :  { %3875 = vmatpush3.msra.mxu0 %v5436_v31 }
 0x3b2   :  { %3877 = vmatmul.mubr.f32.vlgmr.msra.gmra.mxu0 %v5246_v37 }
 0x428   :  { %v2257_v42 = vpop.f32.mrf.mxu1 }
 0x42a   :  { %v3773_v2 = vpop.f32.mrf.mxu1 }
 0x430   :  { %v2106_v50 = vpop.f32.mrf.mxu0 }
 0x431   :  { %v2258_v9 = vadd.f32 %v2257_v42, %v2106_v50 }
 0x432   :  { %v3738_v51 = vpop.f32.mrf.mxu0 }
 0x448   :  { %v2450_v16 = vpop.f32.mrf.mxu1 }
 0x44a   :  { %v3843_v30 = vpop.f32.mrf.mxu1 }
 0x451   :  { %v2361_v32 = vpop.f32.mrf.mxu0 }
 0x452   :  { %v2362_v24 = vadd.f32 %v2361_v32, %v2258_v9 }
 0x453   :  { %v3808_v36 = vpop.f32.mrf.mxu0 }
 0x454   :  { %v2451_v23 = vadd.f32 %v2450_v16, %v2362_v24 }
 0x46a   :  { %v2656_v44 = vpop.f32.mrf.mxu1 }
 0x46c   :  { %v3913_v22 = vpop.f32.mrf.mxu1 }
 0x472   :  { %v2569_v5 = vpop.f32.mrf.mxu0 }
 0x473   :  { %v2570_v0 = vadd.f32 %v2569_v5, %v2451_v23 }
 0x474   :  { %v3878_v10 = vpop.f32.mrf.mxu0 }
 0x475   :  { %v2657_v11 = vadd.f32 %v2656_v44, %v2570_v0 }
 0x477   :  { %2660 = vst [vmem:[%s5412_s2] sm:$0xff] %v2657_v11 }
 0x478   :  { %2665 = vsyncpa [#allocation3], 1 }

</bundles_post_ra>
